<compile_context>
chip_gen: v5e
topology: v5e:2x2
jax: 0.10.0
libtpu: 0.0.40
codegen_flags: <defaults>
</compile_context>

<pallas_src>
import functools
import math

import jax
import jax.numpy as jnp
from jax import lax
from jax.experimental import pallas as pl
from jax.experimental.pallas import tpu as pltpu

BN_EPS = 1e-5

_COMPILER_PARAMS = pltpu.CompilerParams(
    dimension_semantics=("arbitrary",),
    vmem_limit_bytes=32 * 1024 * 1024,
)


def _full(shape):
    # whole array is one block; grid is a single iteration
    return pl.BlockSpec(shape, lambda i: (0,) * len(shape))


# ----------------------------- Pallas kernels ------------------------------

def _convmm_bn_relu_kernel(p_ref, w_ref, g_ref, b_ref, o_ref):
    """Lane-dense conv-as-matmul: relu(BN(W @ P)) with BN stats per channel.

    p_ref: (K, M)   f32 im2col patches, M = B*OH*OW on the lane axis
    w_ref: (Cout,K) f32 weights
    g_ref, b_ref: (Cout, 1) f32 BN affine
    o_ref: (Cout, M) f32
    """
    y = jnp.dot(w_ref[...], p_ref[...], preferred_element_type=jnp.float32)
    # one-pass batch statistics (biased var, torch train-mode BN); conv bias
    # would cancel in (y - mu) so it is not added at all.
    mu = jnp.mean(y, axis=1, keepdims=True)
    var = jnp.mean(y * y, axis=1, keepdims=True) - mu * mu
    y = (y - mu) * lax.rsqrt(var + BN_EPS)
    y = y * g_ref[...] + b_ref[...]
    o_ref[...] = jnp.maximum(y, 0.0).astype(o_ref.dtype)


def _head_kernel(batch, ohw,
                 p3_ref, w3_ref, g3_ref, b3_ref,
                 w1_ref, g1_ref, b1_ref, w2_ref, bias2_ref, o_ref):
    """Fused tail: conv3(BN,ReLU) + spatial mean + both FC heads.

    p3_ref : (M3, K3) f32 conv3 patches, M3 = batch*ohw
    w3_ref : (K3, C3) f32
    w1_ref : (C3, 2h) f32 (fc_logits_1 | fc_shift_1 concatenated)
    w2_ref : (2h, n_logits+1) f32 block-diagonal output weights
    o_ref  : (batch, n_logits+1) f32
    """
    # conv3 as matmul; here Cout (=120) is the lane-dense axis since M3 is tiny
    y3 = jnp.dot(p3_ref[...], w3_ref[...], preferred_element_type=jnp.float32)
    mu3 = jnp.mean(y3, axis=0, keepdims=True)
    var3 = jnp.mean(y3 * y3, axis=0, keepdims=True) - mu3 * mu3
    y3 = (y3 - mu3) * lax.rsqrt(var3 + BN_EPS)
    y3 = jnp.maximum(y3 * g3_ref[...] + b3_ref[...], 0.0)        # (M3, C3)

    # spatial mean -> features (batch, C3); rows are ordered (b, oh, ow)
    if ohw == 1:
        feats = y3
    else:
        rid = lax.broadcasted_iota(jnp.int32, (batch, batch * ohw), 0)
        cid = lax.broadcasted_iota(jnp.int32, (batch, batch * ohw), 1)
        pool = jnp.where(cid // ohw == rid, 1.0 / ohw, 0.0)
        feats = jnp.dot(pool, y3, preferred_element_type=jnp.float32)

    # both FC hidden layers at once (BN is per-column -> concatenation exact)
    h1 = jnp.dot(feats, w1_ref[...], preferred_element_type=jnp.float32)
    mu1 = jnp.mean(h1, axis=0, keepdims=True)
    var1 = jnp.mean(h1 * h1, axis=0, keepdims=True) - mu1 * mu1
    h1 = (h1 - mu1) * lax.rsqrt(var1 + BN_EPS)
    h1 = jnp.maximum(h1 * g1_ref[...] + b1_ref[...], 0.0)        # (batch, 2h)

    # both output heads via block-diagonal weight (+ bias, no BN here)
    out = jnp.dot(h1, w2_ref[...], preferred_element_type=jnp.float32)
    o_ref[...] = (out + bias2_ref[...]).astype(o_ref.dtype)


# ----------------------------- kernel wrappers ------------------------------

def convmm_bn_relu(p, w, gamma, beta):
    K, M = p.shape
    cout = w.shape[0]
    return pl.pallas_call(
        _convmm_bn_relu_kernel,
        out_shape=jax.ShapeDtypeStruct((cout, M), jnp.float32),
        grid=(1,),
        in_specs=[_full((K, M)), _full((cout, K)),
                  _full((cout, 1)), _full((cout, 1))],
        out_specs=_full((cout, M)),
        compiler_params=_COMPILER_PARAMS,
    )(p, w, gamma, beta)


def fused_head(p3, w3, g3, b3, w1, g1, b1, w2, bias2, *, batch, ohw):
    M3, K3 = p3.shape
    C3 = w3.shape[1]
    H2 = w1.shape[1]
    NOUT = w2.shape[1]
    kernel = functools.partial(_head_kernel, batch, ohw)
    return pl.pallas_call(
        kernel,
        out_shape=jax.ShapeDtypeStruct((batch, NOUT), jnp.float32),
        grid=(1,),
        in_specs=[_full((M3, K3)), _full((K3, C3)),
                  _full((1, C3)), _full((1, C3)),
                  _full((C3, H2)), _full((1, H2)), _full((1, H2)),
                  _full((H2, NOUT)), _full((1, NOUT))],
        out_specs=_full((batch, NOUT)),
        compiler_params=_COMPILER_PARAMS,
    )(p3, w3, g3, b3, w1, g1, b1, w2, bias2)


# ------------------------------- JAX glue ----------------------------------

def _im2col_T(x, k):
    """x: (C, B, H, W) channel-major -> patches (C*k*k, B*OH*OW), VALID windows."""
    C, B, H, W = x.shape
    OH, OW = H - k + 1, W - k + 1
    taps = []
    for kh in range(k):
        for kw in range(k):
            taps.append(x[:, :, kh:kh + OH, kw:kw + OW])
    p = jnp.stack(taps, axis=1)                         # (C, k*k, B, OH, OW)
    return p.reshape(C * k * k, B * OH * OW), (B, OH, OW)


def conv5x5_bn_relu(x, w, gamma, beta):
    """x: (Cin, B, H, W); w: (Cout, Cin, 5, 5) -> (Cout, B, OH, OW) f32."""
    cout, k = w.shape[0], w.shape[-1]
    p, (B, OH, OW) = _im2col_T(x, k)
    y = convmm_bn_relu(p.astype(jnp.float32),
                       w.reshape(cout, -1).astype(jnp.float32),
                       gamma.reshape(cout, 1), beta.reshape(cout, 1))
    return y.reshape(cout, B, OH, OW)


def maxpool2x2(x):
    """MaxPool2d(2, 2) on channel-major (C, B, H, W) (reshape glue)."""
    C, B, H, W = x.shape
    return x.reshape(C, B, H // 2, 2, W // 2, 2).max(axis=(3, 5))


# ------------------------------ parameters ---------------------------------

def init_params(key, dim, channels=3, width=2):
    c1, c2, c3 = 3 * width, 8 * width, 60 * width
    h = 42 * width
    n_logits = math.prod(dim)
    keys = jax.random.split(key, 7)

    def conv_p(k, cin, cout):          # no bias: cancels under train-mode BN
        k0, k1, k2 = jax.random.split(k, 3)
        w = jax.random.normal(k0, (cout, cin, 5, 5), jnp.float32) / math.sqrt(25 * cin)
        gamma = 1.0 + 0.1 * jax.random.normal(k1, (cout,), jnp.float32)
        beta = 0.1 * jax.random.normal(k2, (cout,), jnp.float32)
        return (w, gamma, beta)

    def lin_bn_p(k, cin, cout):        # no bias: cancels under train-mode BN
        k0, k1, k2 = jax.random.split(k, 3)
        w = jax.random.normal(k0, (cin, cout), jnp.float32) / math.sqrt(cin)
        gamma = 1.0 + 0.1 * jax.random.normal(k1, (cout,), jnp.float32)
        beta = 0.1 * jax.random.normal(k2, (cout,), jnp.float32)
        return (w, gamma, beta)

    def lin_p(k, cin, cout):
        k0, k1 = jax.random.split(k, 2)
        w = jax.random.normal(k0, (cin, cout), jnp.float32) / math.sqrt(cin)
        b = 0.1 * jax.random.normal(k1, (cout,), jnp.float32)
        return (w, b)

    return {
        "conv1": conv_p(keys[0], channels, c1),
        "conv2": conv_p(keys[1], c1, c2),
        "conv3": conv_p(keys[2], c2, c3),
        "fc_logits_1": lin_bn_p(keys[3], c3, h),
        "fc_logits_2": lin_p(keys[4], h, n_logits),
        "fc_shift_1": lin_bn_p(keys[5], c3, h),
        "fc_shift_2": lin_p(keys[6], h, 1),
    }


# -------------------------------- forward ----------------------------------

def forward(params, x1, x2):
    """x1, x2: (B, C, H, W) NCHW, same convention as the PyTorch module."""
    x = x2 - x1                                       # elementwise diff (glue)
    x = jnp.transpose(x, (1, 0, 2, 3))                # NCHW -> channel-major (C,B,H,W)

    x = conv5x5_bn_relu(x, *params["conv1"])          # (3w, B, H-4,  W-4)
    x = maxpool2x2(x)
    x = conv5x5_bn_relu(x, *params["conv2"])          # (8w, B, ..-4, ..-4)
    x = maxpool2x2(x)

    # ---- fused tail: conv3 + BN + ReLU + spatial mean + both FC heads ----
    w3, g3, b3 = params["conv3"]
    c3 = w3.shape[0]
    p3, (bsz, oh3, ow3) = _im2col_T(x, 5)             # (25*c2, B*oh*ow)
    p3 = p3.T.astype(jnp.float32)                     # (M3, K3)
    w3m = w3.reshape(c3, -1).T.astype(jnp.float32)    # (K3, c3)

    wl1, gl1, bl1 = params["fc_logits_1"]
    ws1, gs1, bs1 = params["fc_shift_1"]
    w1 = jnp.concatenate([wl1, ws1], axis=1)          # (c3, 2h)
    g1 = jnp.concatenate([gl1, gs1]).reshape(1, -1)
    b1 = jnp.concatenate([bl1, bs1]).reshape(1, -1)

    wl2, bl2 = params["fc_logits_2"]
    ws2, bs2 = params["fc_shift_2"]
    h = wl2.shape[0]
    n_logits = wl2.shape[1]
    w2 = jnp.zeros((2 * h, n_logits + 1), jnp.float32)
    w2 = w2.at[:h, :n_logits].set(wl2).at[h:, n_logits:].set(ws2)
    bias2 = jnp.concatenate([bl2, bs2]).reshape(1, -1)

    out = fused_head(p3, w3m, g3.reshape(1, c3), b3.reshape(1, c3),
                     w1, g1, b1, w2, bias2,
                     batch=bsz, ohw=oh3 * ow3)        # (B, n_logits+1)

    logits = out[:, :n_logits]
    shift = out[:, n_logits]                          # == squeeze(-1): keeps batch dim
    return logits, shift


# ---------------------------------- main ------------------------------------

if __name__ == "__main__":
    B, C, H, W = 2, 3, 32, 32      # conv/pool chain ends at 1x1 spatial
    dim = (4, 2)                   # np.product(dim) = 8 logits
    width = 2

    key = jax.random.PRNGKey(0)
    kp, k1, k2 = jax.random.split(key, 3)
    params = init_params(kp, dim, channels=C, width=width)
    x1 = jax.random.normal(k1, (B, C, H, W), jnp.float32)
    x2 = jax.random.normal(k2, (B, C, H, W), jnp.float32)

    fwd = jax.jit(forward)
    logits, shift = fwd(params, x1, x2)
    jax.block_until_ready((logits, shift))

    assert logits.shape == (B, math.prod(dim)), logits.shape
    assert shift.shape == (B,), shift.shape
    print("KERNEL_OK")
</pallas_src>

<mosaic_0001>
module attributes {stable_mosaic.version = 11 : i64} {
  func.func @_convmm_bn_relu_kernel(%arg0: i32, %arg1: memref<75x1568xf32, #tpu.memory_space<vmem>>, %arg2: memref<6x75xf32, #tpu.memory_space<vmem>>, %arg3: memref<6x1xf32, #tpu.memory_space<vmem>>, %arg4: memref<6x1xf32, #tpu.memory_space<vmem>>, %arg5: memref<6x1568xf32, #tpu.memory_space<vmem>>) attributes {dimension_semantics = [#tpu.dimension_semantics<arbitrary>], iteration_bounds = array<i64: 1>, scalar_prefetch = 0 : i64, scratch_operands = 0 : i64, tpu.core_type = #tpu.core_type<tc>, window_params = [{pipeline_mode = #tpu.pipeline_mode<synchronous>, transform_indices = @transform_0, window_bounds = array<i64: 75, 1568>}, {pipeline_mode = #tpu.pipeline_mode<synchronous>, transform_indices = @transform_1, window_bounds = array<i64: 6, 75>}, {pipeline_mode = #tpu.pipeline_mode<synchronous>, transform_indices = @transform_2, window_bounds = array<i64: 6, 1>}, {pipeline_mode = #tpu.pipeline_mode<synchronous>, transform_indices = @transform_3, window_bounds = array<i64: 6, 1>}, {pipeline_mode = #tpu.pipeline_mode<synchronous>, transform_indices = @transform_4, window_bounds = array<i64: 6, 1568>}]} {
    %c0 = arith.constant 0 : index
    %c0_0 = arith.constant 0 : index
    %0 = vector.load %arg2[%c0, %c0_0] : memref<6x75xf32, #tpu.memory_space<vmem>>, vector<6x75xf32>
    %c0_1 = arith.constant 0 : index
    %c0_2 = arith.constant 0 : index
    %1 = vector.load %arg1[%c0_1, %c0_2] : memref<75x1568xf32, #tpu.memory_space<vmem>>, vector<75x1568xf32>
    %cst = arith.constant dense<0.000000e+00> : vector<6x1568xf32>
    %2 = tpu.matmul %0, %1, %cst {dimension_numbers = #tpu.dot_dimension_numbers<[1], [0], [0], [1], [0, 0, 1, 1], [], []>} : vector<6x75xf32>, vector<75x1568xf32>, vector<6x1568xf32> -> vector<6x1568xf32>
    %cst_3 = arith.constant dense<0.000000e+00> : vector<6xf32>
    %3 = vector.multi_reduction <add>, %2, %cst_3 [1] : vector<6x1568xf32> to vector<6xf32>
    %4 = vector.shape_cast %3 : vector<6xf32> to vector<6x1xf32>
    %cst_4 = arith.constant 1.568000e+03 : f32
    %5 = vector.broadcast %cst_4 : f32 to vector<6x1xf32>
    %6 = arith.divf %4, %5 : vector<6x1xf32>
    %7 = arith.mulf %2, %2 : vector<6x1568xf32>
    %cst_5 = arith.constant dense<0.000000e+00> : vector<6xf32>
    %8 = vector.multi_reduction <add>, %7, %cst_5 [1] : vector<6x1568xf32> to vector<6xf32>
    %9 = vector.shape_cast %8 : vector<6xf32> to vector<6x1xf32>
    %cst_6 = arith.constant 1.568000e+03 : f32
    %10 = vector.broadcast %cst_6 : f32 to vector<6x1xf32>
    %11 = arith.divf %9, %10 : vector<6x1xf32>
    %12 = arith.mulf %6, %6 : vector<6x1xf32>
    %13 = arith.subf %11, %12 : vector<6x1xf32>
    %14 = vector.broadcast %6 : vector<6x1xf32> to vector<6x1568xf32>
    %15 = arith.subf %2, %14 : vector<6x1568xf32>
    %cst_7 = arith.constant 9.99999974E-6 : f32
    %16 = vector.broadcast %cst_7 : f32 to vector<6x1xf32>
    %17 = arith.addf %13, %16 : vector<6x1xf32>
    %18 = math.rsqrt %17 : vector<6x1xf32>
    %19 = vector.broadcast %18 : vector<6x1xf32> to vector<6x1568xf32>
    %20 = arith.mulf %15, %19 : vector<6x1568xf32>
    %c0_8 = arith.constant 0 : index
    %c0_9 = arith.constant 0 : index
    %21 = vector.load %arg3[%c0_8, %c0_9] : memref<6x1xf32, #tpu.memory_space<vmem>>, vector<6x1xf32>
    %22 = vector.broadcast %21 : vector<6x1xf32> to vector<6x1568xf32>
    %23 = arith.mulf %20, %22 : vector<6x1568xf32>
    %c0_10 = arith.constant 0 : index
    %c0_11 = arith.constant 0 : index
    %24 = vector.load %arg4[%c0_10, %c0_11] : memref<6x1xf32, #tpu.memory_space<vmem>>, vector<6x1xf32>
    %25 = vector.broadcast %24 : vector<6x1xf32> to vector<6x1568xf32>
    %26 = arith.addf %23, %25 : vector<6x1568xf32>
    %cst_12 = arith.constant 0.000000e+00 : f32
    %27 = vector.broadcast %cst_12 : f32 to vector<6x1568xf32>
    %28 = arith.maximumf %26, %27 : vector<6x1568xf32>
    %c0_13 = arith.constant 0 : index
    %c0_14 = arith.constant 0 : index
    %29 = vector.load %arg5[%c0_13, %c0_14] : memref<6x1568xf32, #tpu.memory_space<vmem>>, vector<6x1568xf32>
    tpu.vector_store %arg5[%c0_13, %c0_14], %28 {strides = array<i32>} : memref<6x1568xf32, #tpu.memory_space<vmem>>, vector<6x1568xf32>,
    return
  }
  func.func @transform_0(%arg0: i32) -> (i32, i32) {
    %c0_i32 = arith.constant 0 : i32
    %c0_i32_0 = arith.constant 0 : i32
    %c0_i32_1 = arith.constant 0 : i32
    return %c0_i32, %c0_i32_0 : i32, i32
  }
  func.func @transform_1(%arg0: i32) -> (i32, i32) {
    %c0_i32 = arith.constant 0 : i32
    %c0_i32_0 = arith.constant 0 : i32
    %c0_i32_1 = arith.constant 0 : i32
    return %c0_i32, %c0_i32_0 : i32, i32
  }
  func.func @transform_2(%arg0: i32) -> (i32, i32) {
    %c0_i32 = arith.constant 0 : i32
    %c0_i32_0 = arith.constant 0 : i32
    %c0_i32_1 = arith.constant 0 : i32
    return %c0_i32, %c0_i32_0 : i32, i32
  }
  func.func @transform_3(%arg0: i32) -> (i32, i32) {
    %c0_i32 = arith.constant 0 : i32
    %c0_i32_0 = arith.constant 0 : i32
    %c0_i32_1 = arith.constant 0 : i32
    return %c0_i32, %c0_i32_0 : i32, i32
  }
  func.func @transform_4(%arg0: i32) -> (i32, i32) {
    %c0_i32 = arith.constant 0 : i32
    %c0_i32_0 = arith.constant 0 : i32
    %c0_i32_1 = arith.constant 0 : i32
    return %c0_i32, %c0_i32_0 : i32, i32
  }
}

module attributes {stable_mosaic.version = 11 : i64} {
  func.func @_convmm_bn_relu_kernel(%arg0: i32, %arg1: memref<150x200xf32, #tpu.memory_space<vmem>>, %arg2: memref<16x150xf32, #tpu.memory_space<vmem>>, %arg3: memref<16x1xf32, #tpu.memory_space<vmem>>, %arg4: memref<16x1xf32, #tpu.memory_space<vmem>>, %arg5: memref<16x200xf32, #tpu.memory_space<vmem>>) attributes {dimension_semantics = [#tpu.dimension_semantics<arbitrary>], iteration_bounds = array<i64: 1>, scalar_prefetch = 0 : i64, scratch_operands = 0 : i64, tpu.core_type = #tpu.core_type<tc>, window_params = [{pipeline_mode = #tpu.pipeline_mode<synchronous>, transform_indices = @transform_0, window_bounds = array<i64: 150, 200>}, {pipeline_mode = #tpu.pipeline_mode<synchronous>, transform_indices = @transform_1, window_bounds = array<i64: 16, 150>}, {pipeline_mode = #tpu.pipeline_mode<synchronous>, transform_indices = @transform_2, window_bounds = array<i64: 16, 1>}, {pipeline_mode = #tpu.pipeline_mode<synchronous>, transform_indices = @transform_3, window_bounds = array<i64: 16, 1>}, {pipeline_mode = #tpu.pipeline_mode<synchronous>, transform_indices = @transform_4, window_bounds = array<i64: 16, 200>}]} {
    %c0 = arith.constant 0 : index
    %c0_0 = arith.constant 0 : index
    %0 = vector.load %arg2[%c0, %c0_0] : memref<16x150xf32, #tpu.memory_space<vmem>>, vector<16x150xf32>
    %c0_1 = arith.constant 0 : index
    %c0_2 = arith.constant 0 : index
    %1 = vector.load %arg1[%c0_1, %c0_2] : memref<150x200xf32, #tpu.memory_space<vmem>>, vector<150x200xf32>
    %cst = arith.constant dense<0.000000e+00> : vector<16x200xf32>
    %2 = tpu.matmul %0, %1, %cst {dimension_numbers = #tpu.dot_dimension_numbers<[1], [0], [0], [1], [0, 0, 1, 1], [], []>} : vector<16x150xf32>, vector<150x200xf32>, vector<16x200xf32> -> vector<16x200xf32>
    %cst_3 = arith.constant dense<0.000000e+00> : vector<16xf32>
    %3 = vector.multi_reduction <add>, %2, %cst_3 [1] : vector<16x200xf32> to vector<16xf32>
    %4 = vector.shape_cast %3 : vector<16xf32> to vector<16x1xf32>
    %cst_4 = arith.constant 2.000000e+02 : f32
    %5 = vector.broadcast %cst_4 : f32 to vector<16x1xf32>
    %6 = arith.divf %4, %5 : vector<16x1xf32>
    %7 = arith.mulf %2, %2 : vector<16x200xf32>
    %cst_5 = arith.constant dense<0.000000e+00> : vector<16xf32>
    %8 = vector.multi_reduction <add>, %7, %cst_5 [1] : vector<16x200xf32> to vector<16xf32>
    %9 = vector.shape_cast %8 : vector<16xf32> to vector<16x1xf32>
    %cst_6 = arith.constant 2.000000e+02 : f32
    %10 = vector.broadcast %cst_6 : f32 to vector<16x1xf32>
    %11 = arith.divf %9, %10 : vector<16x1xf32>
    %12 = arith.mulf %6, %6 : vector<16x1xf32>
    %13 = arith.subf %11, %12 : vector<16x1xf32>
    %14 = vector.broadcast %6 : vector<16x1xf32> to vector<16x200xf32>
    %15 = arith.subf %2, %14 : vector<16x200xf32>
    %cst_7 = arith.constant 9.99999974E-6 : f32
    %16 = vector.broadcast %cst_7 : f32 to vector<16x1xf32>
    %17 = arith.addf %13, %16 : vector<16x1xf32>
    %18 = math.rsqrt %17 : vector<16x1xf32>
    %19 = vector.broadcast %18 : vector<16x1xf32> to vector<16x200xf32>
    %20 = arith.mulf %15, %19 : vector<16x200xf32>
    %c0_8 = arith.constant 0 : index
    %c0_9 = arith.constant 0 : index
    %21 = vector.load %arg3[%c0_8, %c0_9] : memref<16x1xf32, #tpu.memory_space<vmem>>, vector<16x1xf32>
    %22 = vector.broadcast %21 : vector<16x1xf32> to vector<16x200xf32>
    %23 = arith.mulf %20, %22 : vector<16x200xf32>
    %c0_10 = arith.constant 0 : index
    %c0_11 = arith.constant 0 : index
    %24 = vector.load %arg4[%c0_10, %c0_11] : memref<16x1xf32, #tpu.memory_space<vmem>>, vector<16x1xf32>
    %25 = vector.broadcast %24 : vector<16x1xf32> to vector<16x200xf32>
    %26 = arith.addf %23, %25 : vector<16x200xf32>
    %cst_12 = arith.constant 0.000000e+00 : f32
    %27 = vector.broadcast %cst_12 : f32 to vector<16x200xf32>
    %28 = arith.maximumf %26, %27 : vector<16x200xf32>
    %c0_13 = arith.constant 0 : index
    %c0_14 = arith.constant 0 : index
    %29 = vector.load %arg5[%c0_13, %c0_14] : memref<16x200xf32, #tpu.memory_space<vmem>>, vector<16x200xf32>
    tpu.vector_store %arg5[%c0_13, %c0_14], %28 {strides = array<i32>} : memref<16x200xf32, #tpu.memory_space<vmem>>, vector<16x200xf32>,
    return
  }
  func.func @transform_0(%arg0: i32) -> (i32, i32) {
    %c0_i32 = arith.constant 0 : i32
    %c0_i32_0 = arith.constant 0 : i32
    %c0_i32_1 = arith.constant 0 : i32
    return %c0_i32, %c0_i32_0 : i32, i32
  }
  func.func @transform_1(%arg0: i32) -> (i32, i32) {
    %c0_i32 = arith.constant 0 : i32
    %c0_i32_0 = arith.constant 0 : i32
    %c0_i32_1 = arith.constant 0 : i32
    return %c0_i32, %c0_i32_0 : i32, i32
  }
  func.func @transform_2(%arg0: i32) -> (i32, i32) {
    %c0_i32 = arith.constant 0 : i32
    %c0_i32_0 = arith.constant 0 : i32
    %c0_i32_1 = arith.constant 0 : i32
    return %c0_i32, %c0_i32_0 : i32, i32
  }
  func.func @transform_3(%arg0: i32) -> (i32, i32) {
    %c0_i32 = arith.constant 0 : i32
    %c0_i32_0 = arith.constant 0 : i32
    %c0_i32_1 = arith.constant 0 : i32
    return %c0_i32, %c0_i32_0 : i32, i32
  }
  func.func @transform_4(%arg0: i32) -> (i32, i32) {
    %c0_i32 = arith.constant 0 : i32
    %c0_i32_0 = arith.constant 0 : i32
    %c0_i32_1 = arith.constant 0 : i32
    return %c0_i32, %c0_i32_0 : i32, i32
  }
}

module attributes {stable_mosaic.version = 11 : i64} {
  func.func @_head_kernel(%arg0: i32, %arg1: memref<2x400xf32, #tpu.memory_space<vmem>>, %arg2: memref<400x120xf32, #tpu.memory_space<vmem>>, %arg3: memref<1x120xf32, #tpu.memory_space<vmem>>, %arg4: memref<1x120xf32, #tpu.memory_space<vmem>>, %arg5: memref<120x168xf32, #tpu.memory_space<vmem>>, %arg6: memref<1x168xf32, #tpu.memory_space<vmem>>, %arg7: memref<1x168xf32, #tpu.memory_space<vmem>>, %arg8: memref<168x9xf32, #tpu.memory_space<vmem>>, %arg9: memref<1x9xf32, #tpu.memory_space<vmem>>, %arg10: memref<2x9xf32, #tpu.memory_space<vmem>>) attributes {dimension_semantics = [#tpu.dimension_semantics<arbitrary>], iteration_bounds = array<i64: 1>, scalar_prefetch = 0 : i64, scratch_operands = 0 : i64, tpu.core_type = #tpu.core_type<tc>, window_params = [{pipeline_mode = #tpu.pipeline_mode<synchronous>, transform_indices = @transform_0, window_bounds = array<i64: 2, 400>}, {pipeline_mode = #tpu.pipeline_mode<synchronous>, transform_indices = @transform_1, window_bounds = array<i64: 400, 120>}, {pipeline_mode = #tpu.pipeline_mode<synchronous>, transform_indices = @transform_2, window_bounds = array<i64: 1, 120>}, {pipeline_mode = #tpu.pipeline_mode<synchronous>, transform_indices = @transform_3, window_bounds = array<i64: 1, 120>}, {pipeline_mode = #tpu.pipeline_mode<synchronous>, transform_indices = @transform_4, window_bounds = array<i64: 120, 168>}, {pipeline_mode = #tpu.pipeline_mode<synchronous>, transform_indices = @transform_5, window_bounds = array<i64: 1, 168>}, {pipeline_mode = #tpu.pipeline_mode<synchronous>, transform_indices = @transform_6, window_bounds = array<i64: 1, 168>}, {pipeline_mode = #tpu.pipeline_mode<synchronous>, transform_indices = @transform_7, window_bounds = array<i64: 168, 9>}, {pipeline_mode = #tpu.pipeline_mode<synchronous>, transform_indices = @transform_8, window_bounds = array<i64: 1, 9>}, {pipeline_mode = #tpu.pipeline_mode<synchronous>, transform_indices = @transform_9, window_bounds = array<i64: 2, 9>}]} {
    %c0 = arith.constant 0 : index
    %c0_0 = arith.constant 0 : index
    %0 = vector.load %arg1[%c0, %c0_0] : memref<2x400xf32, #tpu.memory_space<vmem>>, vector<2x400xf32>
    %c0_1 = arith.constant 0 : index
    %c0_2 = arith.constant 0 : index
    %1 = vector.load %arg2[%c0_1, %c0_2] : memref<400x120xf32, #tpu.memory_space<vmem>>, vector<400x120xf32>
    %cst = arith.constant dense<0.000000e+00> : vector<2x120xf32>
    %2 = tpu.matmul %0, %1, %cst {dimension_numbers = #tpu.dot_dimension_numbers<[1], [0], [0], [1], [0, 0, 1, 1], [], []>} : vector<2x400xf32>, vector<400x120xf32>, vector<2x120xf32> -> vector<2x120xf32>
    %cst_3 = arith.constant dense<0.000000e+00> : vector<120xf32>
    %3 = vector.multi_reduction <add>, %2, %cst_3 [0] : vector<2x120xf32> to vector<120xf32>
    %4 = vector.shape_cast %3 : vector<120xf32> to vector<1x120xf32>
    %cst_4 = arith.constant 2.000000e+00 : f32
    %5 = vector.broadcast %cst_4 : f32 to vector<1x120xf32>
    %6 = arith.divf %4, %5 : vector<1x120xf32>
    %7 = arith.mulf %2, %2 : vector<2x120xf32>
    %cst_5 = arith.constant dense<0.000000e+00> : vector<120xf32>
    %8 = vector.multi_reduction <add>, %7, %cst_5 [0] : vector<2x120xf32> to vector<120xf32>
    %9 = vector.shape_cast %8 : vector<120xf32> to vector<1x120xf32>
    %cst_6 = arith.constant 2.000000e+00 : f32
    %10 = vector.broadcast %cst_6 : f32 to vector<1x120xf32>
    %11 = arith.divf %9, %10 : vector<1x120xf32>
    %12 = arith.mulf %6, %6 : vector<1x120xf32>
    %13 = arith.subf %11, %12 : vector<1x120xf32>
    %14 = vector.broadcast %6 : vector<1x120xf32> to vector<2x120xf32>
    %15 = arith.subf %2, %14 : vector<2x120xf32>
    %cst_7 = arith.constant 9.99999974E-6 : f32
    %16 = vector.broadcast %cst_7 : f32 to vector<1x120xf32>
    %17 = arith.addf %13, %16 : vector<1x120xf32>
    %18 = math.rsqrt %17 : vector<1x120xf32>
    %19 = vector.broadcast %18 : vector<1x120xf32> to vector<2x120xf32>
    %20 = arith.mulf %15, %19 : vector<2x120xf32>
    %c0_8 = arith.constant 0 : index
    %c0_9 = arith.constant 0 : index
    %21 = vector.load %arg3[%c0_8, %c0_9] : memref<1x120xf32, #tpu.memory_space<vmem>>, vector<1x120xf32>
    %22 = vector.broadcast %21 : vector<1x120xf32> to vector<2x120xf32>
    %23 = arith.mulf %20, %22 : vector<2x120xf32>
    %c0_10 = arith.constant 0 : index
    %c0_11 = arith.constant 0 : index
    %24 = vector.load %arg4[%c0_10, %c0_11] : memref<1x120xf32, #tpu.memory_space<vmem>>, vector<1x120xf32>
    %25 = vector.broadcast %24 : vector<1x120xf32> to vector<2x120xf32>
    %26 = arith.addf %23, %25 : vector<2x120xf32>
    %cst_12 = arith.constant 0.000000e+00 : f32
    %27 = vector.broadcast %cst_12 : f32 to vector<2x120xf32>
    %28 = arith.maximumf %26, %27 : vector<2x120xf32>
    %c0_13 = arith.constant 0 : index
    %c0_14 = arith.constant 0 : index
    %29 = vector.load %arg5[%c0_13, %c0_14] : memref<120x168xf32, #tpu.memory_space<vmem>>, vector<120x168xf32>
    %cst_15 = arith.constant dense<0.000000e+00> : vector<2x168xf32>
    %30 = tpu.matmul %28, %29, %cst_15 {dimension_numbers = #tpu.dot_dimension_numbers<[1], [0], [0], [1], [0, 0, 1, 1], [], []>} : vector<2x120xf32>, vector<120x168xf32>, vector<2x168xf32> -> vector<2x168xf32>
    %cst_16 = arith.constant dense<0.000000e+00> : vector<168xf32>
    %31 = vector.multi_reduction <add>, %30, %cst_16 [0] : vector<2x168xf32> to vector<168xf32>
    %32 = vector.shape_cast %31 : vector<168xf32> to vector<1x168xf32>
    %cst_17 = arith.constant 2.000000e+00 : f32
    %33 = vector.broadcast %cst_17 : f32 to vector<1x168xf32>
    %34 = arith.divf %32, %33 : vector<1x168xf32>
    %35 = arith.mulf %30, %30 : vector<2x168xf32>
    %cst_18 = arith.constant dense<0.000000e+00> : vector<168xf32>
    %36 = vector.multi_reduction <add>, %35, %cst_18 [0] : vector<2x168xf32> to vector<168xf32>
    %37 = vector.shape_cast %36 : vector<168xf32> to vector<1x168xf32>
    %cst_19 = arith.constant 2.000000e+00 : f32
    %38 = vector.broadcast %cst_19 : f32 to vector<1x168xf32>
    %39 = arith.divf %37, %38 : vector<1x168xf32>
    %40 = arith.mulf %34, %34 : vector<1x168xf32>
    %41 = arith.subf %39, %40 : vector<1x168xf32>
    %42 = vector.broadcast %34 : vector<1x168xf32> to vector<2x168xf32>
    %43 = arith.subf %30, %42 : vector<2x168xf32>
    %cst_20 = arith.constant 9.99999974E-6 : f32
    %44 = vector.broadcast %cst_20 : f32 to vector<1x168xf32>
    %45 = arith.addf %41, %44 : vector<1x168xf32>
    %46 = math.rsqrt %45 : vector<1x168xf32>
    %47 = vector.broadcast %46 : vector<1x168xf32> to vector<2x168xf32>
    %48 = arith.mulf %43, %47 : vector<2x168xf32>
    %c0_21 = arith.constant 0 : index
    %c0_22 = arith.constant 0 : index
    %49 = vector.load %arg6[%c0_21, %c0_22] : memref<1x168xf32, #tpu.memory_space<vmem>>, vector<1x168xf32>
    %50 = vector.broadcast %49 : vector<1x168xf32> to vector<2x168xf32>
    %51 = arith.mulf %48, %50 : vector<2x168xf32>
    %c0_23 = arith.constant 0 : index
    %c0_24 = arith.constant 0 : index
    %52 = vector.load %arg7[%c0_23, %c0_24] : memref<1x168xf32, #tpu.memory_space<vmem>>, vector<1x168xf32>
    %53 = vector.broadcast %52 : vector<1x168xf32> to vector<2x168xf32>
    %54 = arith.addf %51, %53 : vector<2x168xf32>
    %cst_25 = arith.constant 0.000000e+00 : f32
    %55 = vector.broadcast %cst_25 : f32 to vector<2x168xf32>
    %56 = arith.maximumf %54, %55 : vector<2x168xf32>
    %c0_26 = arith.constant 0 : index
    %c0_27 = arith.constant 0 : index
    %57 = vector.load %arg8[%c0_26, %c0_27] : memref<168x9xf32, #tpu.memory_space<vmem>>, vector<168x9xf32>
    %cst_28 = arith.constant dense<0.000000e+00> : vector<2x9xf32>
    %58 = tpu.matmul %56, %57, %cst_28 {dimension_numbers = #tpu.dot_dimension_numbers<[1], [0], [0], [1], [0, 0, 1, 1], [], []>} : vector<2x168xf32>, vector<168x9xf32>, vector<2x9xf32> -> vector<2x9xf32>
    %c0_29 = arith.constant 0 : index
    %c0_30 = arith.constant 0 : index
    %59 = vector.load %arg9[%c0_29, %c0_30] : memref<1x9xf32, #tpu.memory_space<vmem>>, vector<1x9xf32>
    %60 = vector.broadcast %59 : vector<1x9xf32> to vector<2x9xf32>
    %61 = arith.addf %58, %60 : vector<2x9xf32>
    %c0_31 = arith.constant 0 : index
    %c0_32 = arith.constant 0 : index
    %62 = vector.load %arg10[%c0_31, %c0_32] : memref<2x9xf32, #tpu.memory_space<vmem>>, vector<2x9xf32>
    tpu.vector_store %arg10[%c0_31, %c0_32], %61 {strides = array<i32>} : memref<2x9xf32, #tpu.memory_space<vmem>>, vector<2x9xf32>,
    return
  }
  func.func @transform_0(%arg0: i32) -> (i32, i32) {
    %c0_i32 = arith.constant 0 : i32
    %c0_i32_0 = arith.constant 0 : i32
    %c0_i32_1 = arith.constant 0 : i32
    return %c0_i32, %c0_i32_0 : i32, i32
  }
  func.func @transform_1(%arg0: i32) -> (i32, i32) {
    %c0_i32 = arith.constant 0 : i32
    %c0_i32_0 = arith.constant 0 : i32
    %c0_i32_1 = arith.constant 0 : i32
    return %c0_i32, %c0_i32_0 : i32, i32
  }
  func.func @transform_2(%arg0: i32) -> (i32, i32) {
    %c0_i32 = arith.constant 0 : i32
    %c0_i32_0 = arith.constant 0 : i32
    %c0_i32_1 = arith.constant 0 : i32
    return %c0_i32, %c0_i32_0 : i32, i32
  }
  func.func @transform_3(%arg0: i32) -> (i32, i32) {
    %c0_i32 = arith.constant 0 : i32
    %c0_i32_0 = arith.constant 0 : i32
    %c0_i32_1 = arith.constant 0 : i32
    return %c0_i32, %c0_i32_0 : i32, i32
  }
  func.func @transform_4(%arg0: i32) -> (i32, i32) {
    %c0_i32 = arith.constant 0 : i32
    %c0_i32_0 = arith.constant 0 : i32
    %c0_i32_1 = arith.constant 0 : i32
    return %c0_i32, %c0_i32_0 : i32, i32
  }
  func.func @transform_5(%arg0: i32) -> (i32, i32) {
    %c0_i32 = arith.constant 0 : i32
    %c0_i32_0 = arith.constant 0 : i32
    %c0_i32_1 = arith.constant 0 : i32
    return %c0_i32, %c0_i32_0 : i32, i32
  }
  func.func @transform_6(%arg0: i32) -> (i32, i32) {
    %c0_i32 = arith.constant 0 : i32
    %c0_i32_0 = arith.constant 0 : i32
    %c0_i32_1 = arith.constant 0 : i32
    return %c0_i32, %c0_i32_0 : i32, i32
  }
  func.func @transform_7(%arg0: i32) -> (i32, i32) {
    %c0_i32 = arith.constant 0 : i32
    %c0_i32_0 = arith.constant 0 : i32
    %c0_i32_1 = arith.constant 0 : i32
    return %c0_i32, %c0_i32_0 : i32, i32
  }
  func.func @transform_8(%arg0: i32) -> (i32, i32) {
    %c0_i32 = arith.constant 0 : i32
    %c0_i32_0 = arith.constant 0 : i32
    %c0_i32_1 = arith.constant 0 : i32
    return %c0_i32, %c0_i32_0 : i32, i32
  }
  func.func @transform_9(%arg0: i32) -> (i32, i32) {
    %c0_i32 = arith.constant 0 : i32
    %c0_i32_0 = arith.constant 0 : i32
    %c0_i32_1 = arith.constant 0 : i32
    return %c0_i32, %c0_i32_0 : i32, i32
  }
}

</mosaic_0001>

<bundles_post_ra>
// kernel: forward.3
= control target key start
LH: loop header
LB: loop body
LE: loop exit
PB: predicated region body
PF: predicated region fallthrough
CT: control target
= control target key end

     0   :  { %vm152_vm0 = vcmask 1042432   ;;  %vm148_vm1 = vcmask 613376   ;;  %vm452_vm2 = vcmask 1045504   ;;  %vm476_vm3 = vcmask 259072   ;;  %s1282_s0 = inlined_call_operand.vmem [shape: f32[75,1568], index: 0, kind: input, shape index: {}]   ;;  %s1283_s1 = inlined_call_operand.vmem [shape: f32[6,75], index: 1, kind: input, shape index: {}]   ;;  %s1284_s2 = inlined_call_operand.vmem [shape: f32[6,1], index: 2, kind: input, shape index: {}]   ;;  %s1285_s3 = inlined_call_operand.vmem [shape: f32[6,1], index: 3, kind: input, shape index: {}]   ;;  %s1286_s4 = inlined_call_operand.vmem [shape: f32[6,1568], index: 4, kind: output, shape index: {}]  }
   0x1   :  { %v135_v0 = vld [vmem:[%s1282_s0 + $0x3a8] sm:$0x7]  ;;  %v137_v1 = vld [vmem:[%s1282_s0 + $0x3b8] sm:$0x7]  ;;  %v122_v2 = vld [vmem:[%s1282_s0 + $0x340] sm:$0xff] }
   0x2   :  { %637 = vmatpush.msk.msra.mxu0 %vm152_vm0, %v135_v0  ;;  %641 = vmatpush.msk.msra.mxu2 %vm152_vm0, %v137_v1  ;;  %v136_v3 = vld [vmem:[%s1282_s0 + $0x3b0] sm:$0x7]  ;;  %v138_v5 = vld [vmem:[%s1282_s0 + $0x3c0] sm:$0x7]  ;;  %v109_v6 = vld [vmem:[%s1282_s0 + $0x2d8] sm:$0xff] }
   0x3   :  { %v124_v4 = vld [vmem:[%s1282_s0 + $0x350] sm:$0xff]  ;;  %639 = vmatpush.msk.msra.mxu1 %vm152_vm0, %v136_v3  ;;  %643 = vmatpush.msk.msra.mxu3 %vm152_vm0, %v138_v5  ;;  %v123_v7 = vld [vmem:[%s1282_s0 + $0x348] sm:$0xff]  ;;  %v125_v9 = vld [vmem:[%s1282_s0 + $0x358] sm:$0xff] }
   0x4   :  { %v111_v8 = vld [vmem:[%s1282_s0 + $0x2e8] sm:$0xff]  ;;  %199 = vmatpush.msra.mxu0 %v122_v2  ;;  %239 = vmatpush.msra.mxu2 %v124_v4  ;;  %v110_v10 = vld [vmem:[%s1282_s0 + $0x2e0] sm:$0xff]  ;;  %v96_v11 = vld [vmem:[%s1282_s0 + $0x270] sm:$0xff] }
   0x5   :  { %219 = vmatpush.msra.mxu1 %v123_v7  ;;  %259 = vmatpush.msra.mxu3 %v125_v9  ;;  %v98_v12 = vld [vmem:[%s1282_s0 + $0x280] sm:$0xff]  ;;  %v112_v13 = vld [vmem:[%s1282_s0 + $0x2f0] sm:$0xff]  ;;  %v97_v14 = vld [vmem:[%s1282_s0 + $0x278] sm:$0xff] }
   0x6   :  { %200 = vmatpush.msra.mxu0 %v109_v6  ;;  %240 = vmatpush.msra.mxu2 %v111_v8  ;;  %v99_v15 = vld [vmem:[%s1282_s0 + $0x288] sm:$0xff]  ;;  %v85_v17 = vld [vmem:[%s1282_s0 + $0x218] sm:$0xff]  ;;  %v84_v18 = vld [vmem:[%s1282_s0 + $0x210] sm:$0xff] }
   0x7   :  { %220 = vmatpush.msra.mxu1 %v110_v10  ;;  %260 = vmatpush.msra.mxu3 %v112_v13  ;;  %v83_v16 = vld [vmem:[%s1282_s0 + $0x208] sm:$0xff]  ;;  %v86_v19 = vld [vmem:[%s1282_s0 + $0x220] sm:$0xff]  ;;  %v72_v21 = vld [vmem:[%s1282_s0 + $0x1b0] sm:$0xff] }
   0x8   :  { %201 = vmatpush.msra.mxu0 %v96_v11  ;;  %241 = vmatpush.msra.mxu2 %v98_v12  ;;  %v70_v20 = vld [vmem:[%s1282_s0 + $0x1a0] sm:$0xff]  ;;  %v71_v22 = vld [vmem:[%s1282_s0 + $0x1a8] sm:$0xff]  ;;  %v73_v23 = vld [vmem:[%s1282_s0 + $0x1b8] sm:$0xff] }
   0x9   :  { %221 = vmatpush.msra.mxu1 %v97_v14  ;;  %261 = vmatpush.msra.mxu3 %v99_v15  ;;  %v57_v24 = vld [vmem:[%s1282_s0 + $0x138] sm:$0xff]  ;;  %v59_v25 = vld [vmem:[%s1282_s0 + $0x148] sm:$0xff]  ;;  %v58_v26 = vld [vmem:[%s1282_s0 + $0x140] sm:$0xff] }
   0xa   :  { %202 = vmatpush.msra.mxu0 %v83_v16  ;;  %242 = vmatpush.msra.mxu2 %v85_v17  ;;  %v60_v27 = vld [vmem:[%s1282_s0 + $0x150] sm:$0xff]  ;;  %v46_v29 = vld [vmem:[%s1282_s0 + $0xe0] sm:$0xff]  ;;  %v45_v30 = vld [vmem:[%s1282_s0 + $0xd8] sm:$0xff] }
   0xb   :  { %222 = vmatpush.msra.mxu1 %v84_v18  ;;  %262 = vmatpush.msra.mxu3 %v86_v19  ;;  %v44_v28 = vld [vmem:[%s1282_s0 + $0xd0] sm:$0xff]  ;;  %v47_v31 = vld [vmem:[%s1282_s0 + $0xe8] sm:$0xff]  ;;  %v33_v33 = vld [vmem:[%s1282_s0 + $0x78] sm:$0xff] }
   0xc   :  { %203 = vmatpush.msra.mxu0 %v70_v20  ;;  %243 = vmatpush.msra.mxu2 %v72_v21  ;;  %v31_v32 = vld [vmem:[%s1282_s0 + $0x68] sm:$0xff]  ;;  %v32_v34 = vld [vmem:[%s1282_s0 + $0x70] sm:$0xff]  ;;  %v34_v35 = vld [vmem:[%s1282_s0 + $0x80] sm:$0xff] }
   0xd   :  { %223 = vmatpush.msra.mxu1 %v71_v22  ;;  %263 = vmatpush.msra.mxu3 %v73_v23  ;;  %v18_v36 = vld [vmem:[%s1282_s0] sm:$0xff]  ;;  %v20_v37 = vld [vmem:[%s1282_s0 + $0x10] sm:$0xff]  ;;  %v139_v38 = vld [vmem:[%s1282_s0 + $0x3c8] sm:$0x7] }
   0xe   :  { %204 = vmatpush.msra.mxu0 %v57_v24  ;;  %244 = vmatpush.msra.mxu2 %v59_v25  ;;  %v141_v39 = vld [vmem:[%s1282_s0 + $0x3d8] sm:$0x7]  ;;  %v19_v40 = vld [vmem:[%s1282_s0 + $0x8] sm:$0xff]  ;;  %v126_v42 = vld [vmem:[%s1282_s0 + $0x360] sm:$0xff] }
   0xf   :  { %224 = vmatpush.msra.mxu1 %v58_v26  ;;  %264 = vmatpush.msra.mxu3 %v60_v27  ;;  %v21_v41 = vld [vmem:[%s1282_s0 + $0x18] sm:$0xff]  ;;  %v140_v43 = vld [vmem:[%s1282_s0 + $0x3d0] sm:$0x7]  ;;  %v142_v45 = vld [vmem:[%s1282_s0 + $0x3e0] sm:$0x7] }
  0x10   :  { %205 = vmatpush.msra.mxu0 %v44_v28  ;;  %245 = vmatpush.msra.mxu2 %v46_v29  ;;  %v128_v44 = vld [vmem:[%s1282_s0 + $0x370] sm:$0xff]  ;;  %v113_v46 = vld [vmem:[%s1282_s0 + $0x2f8] sm:$0xff]  ;;  %v127_v47 = vld [vmem:[%s1282_s0 + $0x368] sm:$0xff] }
  0x11   :  { %225 = vmatpush.msra.mxu1 %v45_v30  ;;  %265 = vmatpush.msra.mxu3 %v47_v31  ;;  %v115_v48 = vld [vmem:[%s1282_s0 + $0x308] sm:$0xff]  ;;  %v129_v49 = vld [vmem:[%s1282_s0 + $0x378] sm:$0xff]  ;;  %v100_v50 = vld [vmem:[%s1282_s0 + $0x290] sm:$0xff] }
  0x12   :  { %206 = vmatpush.msra.mxu0 %v31_v32  ;;  %246 = vmatpush.msra.mxu2 %v33_v33  ;;  %v114_v51 = vld [vmem:[%s1282_s0 + $0x300] sm:$0xff]  ;;  %v116_v53 = vld [vmem:[%s1282_s0 + $0x310] sm:$0xff]  ;;  %v87_v54 = vld [vmem:[%s1282_s0 + $0x228] sm:$0xff] }
  0x13   :  { %226 = vmatpush.msra.mxu1 %v32_v34  ;;  %266 = vmatpush.msra.mxu3 %v34_v35  ;;  %v102_v52 = vld [vmem:[%s1282_s0 + $0x2a0] sm:$0xff]  ;;  %v101_v55 = vld [vmem:[%s1282_s0 + $0x298] sm:$0xff]  ;;  %v103_v57 = vld [vmem:[%s1282_s0 + $0x2a8] sm:$0xff] }
  0x14   :  { %207 = vmatpush.msra.mxu0 %v18_v36  ;;  %247 = vmatpush.msra.mxu2 %v20_v37  ;;  %v89_v56 = vld [vmem:[%s1282_s0 + $0x238] sm:$0xff]  ;;  %v74_v58 = vld [vmem:[%s1282_s0 + $0x1c0] sm:$0xff]  ;;  %v88_v59 = vld [vmem:[%s1282_s0 + $0x230] sm:$0xff] }
  0x15   :  { %227 = vmatpush.msra.mxu1 %v19_v40  ;;  %267 = vmatpush.msra.mxu3 %v21_v41  ;;  %v76_v60 = vld [vmem:[%s1282_s0 + $0x1d0] sm:$0xff]  ;;  %v90_v61 = vld [vmem:[%s1282_s0 + $0x240] sm:$0xff]  ;;  %v61_v62 = vld [vmem:[%s1282_s0 + $0x158] sm:$0xff] }
  0x16   :  { %645 = vmatpush.msk.msrb.mxu0 %vm152_vm0, %v139_v38  ;;  %649 = vmatpush.msk.msrb.mxu2 %vm152_vm0, %v141_v39  ;;  %v75_v63 = vld [vmem:[%s1282_s0 + $0x1c8] sm:$0xff]  ;;  %v77_v1 = vld [vmem:[%s1282_s0 + $0x1d8] sm:$0xff]  ;;  %v48_v2 = vld [vmem:[%s1282_s0 + $0xf0] sm:$0xff] }
  0x17   :  { %647 = vmatpush.msk.msrb.mxu1 %vm152_vm0, %v140_v43  ;;  %651 = vmatpush.msk.msrb.mxu3 %vm152_vm0, %v142_v45  ;;  %v63_v0 = vld [vmem:[%s1282_s0 + $0x168] sm:$0xff]  ;;  %v62_v3 = vld [vmem:[%s1282_s0 + $0x160] sm:$0xff]  ;;  %v64_v5 = vld [vmem:[%s1282_s0 + $0x170] sm:$0xff] }
  0x18   :  { %279 = vmatpush.msrb.mxu0 %v126_v42  ;;  %319 = vmatpush.msrb.mxu2 %v128_v44  ;;  %v50_v4 = vld [vmem:[%s1282_s0 + $0x100] sm:$0xff]  ;;  %v35_v7 = vld [vmem:[%s1282_s0 + $0x88] sm:$0xff]  ;;  %v49_v8 = vld [vmem:[%s1282_s0 + $0xf8] sm:$0xff] }
  0x19   :  { %299 = vmatpush.msrb.mxu1 %v127_v47  ;;  %339 = vmatpush.msrb.mxu3 %v129_v49  ;;  %v919_v6 = vld [vmem:[%s1283_s1] sm:$0x3f]  ;;  %v37_v9 = vld [vmem:[%s1282_s0 + $0x98] sm:$0xff]  ;;  %v51_v10 = vld [vmem:[%s1282_s0 + $0x108] sm:$0xff] }
  0x1a   :  { %280 = vmatpush.msrb.mxu0 %v113_v46  ;;  %320 = vmatpush.msrb.mxu2 %v115_v48  ;;  %v22_v11 = vld [vmem:[%s1282_s0 + $0x20] sm:$0xff]  ;;  %v36_v12 = vld [vmem:[%s1282_s0 + $0x90] sm:$0xff]  ;;  %v143_v15 = vld [vmem:[%s1282_s0 + $0x3e8] sm:$0x7] }
  0x1b   :  { %300 = vmatpush.msrb.mxu1 %v114_v51  ;;  %340 = vmatpush.msrb.mxu3 %v116_v53  ;;  %v24_v13 = vld [vmem:[%s1282_s0 + $0x30] sm:$0xff]  ;;  %v38_v14 = vld [vmem:[%s1282_s0 + $0xa0] sm:$0xff]  ;;  %v145_v16 = vld [vmem:[%s1282_s0 + $0x3f8] sm:$0x7] }
  0x1c   :  { %281 = vmatpush.msrb.mxu0 %v100_v50  ;;  %321 = vmatpush.msrb.mxu2 %v102_v52  ;;  %v23_v17 = vld [vmem:[%s1282_s0 + $0x28] sm:$0xff]  ;;  %v25_v18 = vld [vmem:[%s1282_s0 + $0x38] sm:$0xff]  ;;  %v130_v19 = vld [vmem:[%s1282_s0 + $0x380] sm:$0xff] }
  0x1d   :  { %301 = vmatpush.msrb.mxu1 %v101_v55  ;;  %341 = vmatpush.msrb.mxu3 %v103_v57  ;;  %v144_v20 = vld [vmem:[%s1282_s0 + $0x3f0] sm:$0x7]  ;;  %v146_v22 = vld [vmem:[%s1282_s0 + $0x400] sm:$0x7]  ;;  %v117_v23 = vld [vmem:[%s1282_s0 + $0x318] sm:$0xff] }
  0x1e   :  { %282 = vmatpush.msrb.mxu0 %v87_v54  ;;  %322 = vmatpush.msrb.mxu2 %v89_v56  ;;  %v132_v21 = vld [vmem:[%s1282_s0 + $0x390] sm:$0xff]  ;;  %v131_v24 = vld [vmem:[%s1282_s0 + $0x388] sm:$0xff]  ;;  %v133_v26 = vld [vmem:[%s1282_s0 + $0x398] sm:$0xff] }
  0x1f   :  { %302 = vmatpush.msrb.mxu1 %v88_v59  ;;  %342 = vmatpush.msrb.mxu3 %v90_v61  ;;  %v119_v25 = vld [vmem:[%s1282_s0 + $0x328] sm:$0xff]  ;;  %v104_v27 = vld [vmem:[%s1282_s0 + $0x2b0] sm:$0xff]  ;;  %v118_v28 = vld [vmem:[%s1282_s0 + $0x320] sm:$0xff] }
  0x20   :  { %283 = vmatpush.msrb.mxu0 %v74_v58  ;;  %323 = vmatpush.msrb.mxu2 %v76_v60  ;;  %v106_v29 = vld [vmem:[%s1282_s0 + $0x2c0] sm:$0xff]  ;;  %v120_v30 = vld [vmem:[%s1282_s0 + $0x330] sm:$0xff]  ;;  %v91_v31 = vld [vmem:[%s1282_s0 + $0x248] sm:$0xff] }
  0x21   :  { %303 = vmatpush.msrb.mxu1 %v75_v63  ;;  %343 = vmatpush.msrb.mxu3 %v77_v1  ;;  %v105_v32 = vld [vmem:[%s1282_s0 + $0x2b8] sm:$0xff]  ;;  %v107_v34 = vld [vmem:[%s1282_s0 + $0x2c8] sm:$0xff]  ;;  %v78_v35 = vld [vmem:[%s1282_s0 + $0x1e0] sm:$0xff] }
  0x22   :  { %284 = vmatpush.msrb.mxu0 %v61_v62  ;;  %324 = vmatpush.msrb.mxu2 %v63_v0  ;;  %v93_v33 = vld [vmem:[%s1282_s0 + $0x258] sm:$0xff]  ;;  %v92_v36 = vld [vmem:[%s1282_s0 + $0x250] sm:$0xff]  ;;  %v94_v38 = vld [vmem:[%s1282_s0 + $0x260] sm:$0xff] }
  0x23   :  { %304 = vmatpush.msrb.mxu1 %v62_v3  ;;  %344 = vmatpush.msrb.mxu3 %v64_v5  ;;  %v80_v37 = vld [vmem:[%s1282_s0 + $0x1f0] sm:$0xff]  ;;  %v65_v39 = vld [vmem:[%s1282_s0 + $0x178] sm:$0xff]  ;;  %v79_v40 = vld [vmem:[%s1282_s0 + $0x1e8] sm:$0xff] }
  0x24   :  { %285 = vmatpush.msrb.mxu0 %v48_v2  ;;  %325 = vmatpush.msrb.mxu2 %v50_v4  ;;  %v67_v41 = vld [vmem:[%s1282_s0 + $0x188] sm:$0xff]  ;;  %v81_v42 = vld [vmem:[%s1282_s0 + $0x1f8] sm:$0xff]  ;;  %v52_v43 = vld [vmem:[%s1282_s0 + $0x110] sm:$0xff] }
  0x25   :  { %642 = vmatmul.msk.f32.vlgmr.msra.gmra.mxu2 %vm148_vm1, %v919_v6  ;;  %305 = vmatpush.msrb.mxu1 %v49_v8  ;;  %v66_v44 = vld [vmem:[%s1282_s0 + $0x180] sm:$0xff]  ;;  %v68_v46 = vld [vmem:[%s1282_s0 + $0x190] sm:$0xff]  ;;  %v39_v47 = vld [vmem:[%s1282_s0 + $0xa8] sm:$0xff] }
  0x26   :  { %286 = vmatpush.msrb.mxu0 %v35_v7  ;;  %326 = vmatpush.msrb.mxu2 %v37_v9  ;;  %v54_v45 = vld [vmem:[%s1282_s0 + $0x120] sm:$0xff]  ;;  %v53_v48 = vld [vmem:[%s1282_s0 + $0x118] sm:$0xff]  ;;  %v55_v50 = vld [vmem:[%s1282_s0 + $0x128] sm:$0xff] }
  0x27   :  { %345 = vmatpush.msrb.mxu3 %v51_v10  ;;  %638 = vmatmul.msk.f32.vlgmr.msra.gmra.mxu0 %vm148_vm1, %v919_v6  ;;  %v41_v49 = vld [vmem:[%s1282_s0 + $0xb8] sm:$0xff]  ;;  %v26_v51 = vld [vmem:[%s1282_s0 + $0x40] sm:$0xff]  ;;  %v40_v52 = vld [vmem:[%s1282_s0 + $0xb0] sm:$0xff] }
  0x28   :  { %644 = vmatmul.msk.f32.vlgmr.msra.gmra.mxu3 %vm148_vm1, %v919_v6  ;;  %287 = vmatpush.msrb.mxu0 %v22_v11  ;;  %v28_v53 = vld [vmem:[%s1282_s0 + $0x50] sm:$0xff]  ;;  %v42_v54 = vld [vmem:[%s1282_s0 + $0xc0] sm:$0xff]  ;;  %v147_v55 = vld [vmem:[%s1282_s0 + $0x408] sm:$0x7] }
  0x29   :  { %306 = vmatpush.msrb.mxu1 %v36_v12  ;;  %327 = vmatpush.msrb.mxu2 %v24_v13  ;;  %v27_v56 = vld [vmem:[%s1282_s0 + $0x48] sm:$0xff]  ;;  %v29_v57 = vld [vmem:[%s1282_s0 + $0x58] sm:$0xff]  ;;  %v134_v58 = vld [vmem:[%s1282_s0 + $0x3a0] sm:$0xff] }
  0x2a   :  { %346 = vmatpush.msrb.mxu3 %v38_v14  ;;  %640 = vmatmul.msk.f32.vlgmr.msra.gmra.mxu1 %vm148_vm1, %v919_v6  ;;  %v121_v59 = vld [vmem:[%s1282_s0 + $0x338] sm:$0xff]  ;;  %v108_v60 = vld [vmem:[%s1282_s0 + $0x2d0] sm:$0xff]  ;;  %v95_v61 = vld [vmem:[%s1282_s0 + $0x268] sm:$0xff] }
  0x2b   :  { %653 = vmatpush.msk.msra.mxu0 %vm152_vm0, %v143_v15  ;;  %657 = vmatpush.msk.msra.mxu2 %vm152_vm0, %v145_v16  ;;  %v82_v62 = vld [vmem:[%s1282_s0 + $0x200] sm:$0xff]  ;;  %v69_v63 = vld [vmem:[%s1282_s0 + $0x198] sm:$0xff]  ;;  %v56_v0 = vld [vmem:[%s1282_s0 + $0x130] sm:$0xff] }
  0x2c   :  { %307 = vmatpush.msrb.mxu1 %v23_v17  ;;  %347 = vmatpush.msrb.mxu3 %v25_v18  ;;  %v43_v1 = vld [vmem:[%s1282_s0 + $0xc8] sm:$0xff]  ;;  %v30_v2 = vld [vmem:[%s1282_s0 + $0x60] sm:$0xff] }
  0x2d   :  { %359 = vmatpush.msra.mxu0 %v130_v19  ;;  %399 = vmatpush.msra.mxu2 %v132_v21 }
  0x2e   :  { %655 = vmatpush.msk.msra.mxu1 %vm152_vm0, %v144_v20  ;;  %659 = vmatpush.msk.msra.mxu3 %vm152_vm0, %v146_v22 }
  0x2f   :  { %650 = vmatmul.msk.f32.vlgmr.msrb.gmra.mxu2 %vm148_vm1, %v919_v6  ;;  %360 = vmatpush.msra.mxu0 %v117_v23 }
  0x30   :  { %379 = vmatpush.msra.mxu1 %v131_v24  ;;  %400 = vmatpush.msra.mxu2 %v119_v25 }
  0x31   :  { %419 = vmatpush.msra.mxu3 %v133_v26  ;;  %646 = vmatmul.msk.f32.vlgmr.msrb.gmra.mxu0 %vm148_vm1, %v919_v6 }
  0x32   :  { %652 = vmatmul.msk.f32.vlgmr.msrb.gmra.mxu3 %vm148_vm1, %v919_v6  ;;  %361 = vmatpush.msra.mxu0 %v104_v27 }
  0x33   :  { %380 = vmatpush.msra.mxu1 %v118_v28  ;;  %401 = vmatpush.msra.mxu2 %v106_v29 }
  0x34   :  { %420 = vmatpush.msra.mxu3 %v120_v30  ;;  %648 = vmatmul.msk.f32.vlgmr.msrb.gmra.mxu1 %vm148_vm1, %v919_v6 }
  0x35   :  { %362 = vmatpush.msra.mxu0 %v91_v31  ;;  %381 = vmatpush.msra.mxu1 %v105_v32 }
  0x36   :  { %402 = vmatpush.msra.mxu2 %v93_v33  ;;  %421 = vmatpush.msra.mxu3 %v107_v34  ;;  %v569_v33 = vld [vmem:[%s1284_s2] sm:$0x3f] }
  0x37   :  { %363 = vmatpush.msra.mxu0 %v78_v35  ;;  %382 = vmatpush.msra.mxu1 %v92_v36 }
  0x38   :  { %403 = vmatpush.msra.mxu2 %v80_v37  ;;  %422 = vmatpush.msra.mxu3 %v94_v38  ;;  %v671_v37 = vmov 0  }
  0x39   :  { %364 = vmatpush.msra.mxu0 %v65_v39  ;;  %383 = vmatpush.msra.mxu1 %v79_v40 }
  0x3a   :  { %404 = vmatpush.msra.mxu2 %v67_v41  ;;  %423 = vmatpush.msra.mxu3 %v81_v42 }
  0x3b   :  { %365 = vmatpush.msra.mxu0 %v52_v43  ;;  %384 = vmatpush.msra.mxu1 %v66_v44 }
  0x3c   :  { %405 = vmatpush.msra.mxu2 %v54_v45  ;;  %424 = vmatpush.msra.mxu3 %v68_v46  ;;  %v588_v46 = vld [vmem:[%s1285_s3] sm:$0x3f] }
  0x3d   :  { %366 = vmatpush.msra.mxu0 %v39_v47  ;;  %385 = vmatpush.msra.mxu1 %v53_v48 }
  0x3e   :  { %406 = vmatpush.msra.mxu2 %v41_v49  ;;  %425 = vmatpush.msra.mxu3 %v55_v50 }
  0x3f   :  { %367 = vmatpush.msra.mxu0 %v26_v51  ;;  %386 = vmatpush.msra.mxu1 %v40_v52 }
  0x40   :  { %407 = vmatpush.msra.mxu2 %v28_v53  ;;  %426 = vmatpush.msra.mxu3 %v42_v54 }
  0x41   :  { %654 = vmatmul.msk.f32.vlgmr.msra.gmra.mxu0 %vm148_vm1, %v919_v6  ;;  %658 = vmatmul.msk.f32.vlgmr.msra.gmra.mxu2 %vm148_vm1, %v919_v6 }
  0x42   :  { %661 = vmatpush.msk.msrb.mxu0 %vm152_vm0, %v147_v55  ;;  %387 = vmatpush.msra.mxu1 %v27_v56 }
  0x43   :  { %427 = vmatpush.msra.mxu3 %v29_v57  ;;  %656 = vmatmul.msk.f32.vlgmr.msra.gmra.mxu1 %vm148_vm1, %v919_v6 }
  0x44   :  { %660 = vmatmul.msk.f32.vlgmr.msra.gmra.mxu3 %vm148_vm1, %v919_v6  ;;  %439 = vmatpush.msrb.mxu0 %v134_v58 }
  0x45   :  { %665 = vset.pattern.permute.xlu1 %v671_v37  ;;  %666 = vset.pattern.permute.xlu0 %v671_v37 }
  0x46   :  { %440 = vmatpush.msrb.mxu0 %v121_v59  ;;  %572 = vperm.xlu1 %665, %v569_v33  }
  0x48   :  { %441 = vmatpush.msrb.mxu0 %v108_v60 }
  0x4a   :  { %442 = vmatpush.msrb.mxu0 %v95_v61 }
  0x4c   :  { %443 = vmatpush.msrb.mxu0 %v82_v62 }
  0x4e   :  { %444 = vmatpush.msrb.mxu0 %v69_v63  ;;  %591 = vperm.xlu1 %665, %v588_v46  }
  0x50   :  { %445 = vmatpush.msrb.mxu0 %v56_v0 }
  0x52   :  { %446 = vmatpush.msrb.mxu0 %v43_v1 }
  0x54   :  { %447 = vmatpush.msrb.mxu0 %v30_v2 }
  0x55   :  { %662 = vmatmul.msk.f32.vlgmr.msrb.gmra.mxu0 %vm148_vm1, %v919_v6 }
  0xa4   :  { %v1134_v4 = vpop.f32.mrf.mxu0 }
  0xa5   :  { %v453_v5 = vsel %vm452_vm2, %v1134_v4, 0.0  ;;  %v489_v10 = vmul.f32 %v1134_v4, %v1134_v4 }
  0xa7   :  { %v1132_v3 = vpop.f32.mrf.mxu1  ;;  %v502_v14 = vsel %vm452_vm2, %v489_v10, 0.0 }
  0xa8   :  { %v454_v7 = vsel %vm452_vm2, %v1132_v3, 0.0  ;;  %v1140_v8 = vpop.f32.mrf.mxu2  ;;  %v490_v6 = vmul.f32 %v1132_v3, %v1132_v3 }
  0xa9   :  { %v455_v9 = vadd.f32 %v454_v7, %v453_v5  ;;  %v456_v11 = vsel %vm452_vm2, %v1140_v8, 0.0  ;;  %v491_v16 = vmul.f32 %v1140_v8, %v1140_v8 }
  0xaa   :  { %v503_v15 = vsel %vm452_vm2, %v490_v6, 0.0 }
  0xab   :  { %v1148_v12 = vpop.f32.mrf.mxu3  ;;  %v457_v13 = vadd.f32 %v456_v11, %v455_v9  ;;  %v504_v19 = vadd.f32 %v503_v15, %v502_v14  ;;  %v505_v21 = vsel %vm452_vm2, %v491_v16, 0.0 }
  0xac   :  { %v458_v17 = vsel %vm452_vm2, %v1148_v12, 0.0  ;;  %v492_v22 = vmul.f32 %v1148_v12, %v1148_v12 }
  0xad   :  { %v459_v20 = vadd.f32 %v458_v17, %v457_v13  ;;  %v506_v25 = vadd.f32 %v505_v21, %v504_v19 }
  0xae   :  { %v1156_v18 = vpop.f32.mrf.mxu0  ;;  %v507_v27 = vsel %vm452_vm2, %v492_v22, 0.0 }
  0xaf   :  { %v460_v23 = vsel %vm452_vm2, %v1156_v18, 0.0  ;;  %v493_v28 = vmul.f32 %v1156_v18, %v1156_v18  ;;  %v508_v31 = vadd.f32 %v507_v27, %v506_v25 }
  0xb0   :  { %v461_v26 = vadd.f32 %v460_v23, %v459_v20  ;;  %v672_v23 = vmov 1568.0  }
  0xb1   :  { %v1163_v24 = vpop.f32.mrf.mxu1  ;;  %v509_v34 = vsel %vm452_vm2, %v493_v28, 0.0  ;;  %667 = vrcp.f32 %v672_v23 }
  0xb2   :  { %v462_v29 = vsel %vm452_vm2, %v1163_v24, 0.0  ;;  %v1170_v30 = vpop.f32.mrf.mxu2  ;;  %v494_v35 = vmul.f32 %v1163_v24, %v1163_v24  ;;  %v510_v39 = vadd.f32 %v509_v34, %v508_v31 }
  0xb3   :  { %v463_v32 = vadd.f32 %v462_v29, %v461_v26  ;;  %v464_v36 = vsel %vm452_vm2, %v1170_v30, 0.0  ;;  %v495_v43 = vmul.f32 %v1170_v30, %v1170_v30 }
  0xb4   :  { %v511_v42 = vsel %vm452_vm2, %v494_v35, 0.0 }
  0xb5   :  { %v1180_v38 = vpop.f32.mrf.mxu3  ;;  %v465_v40 = vadd.f32 %v464_v36, %v463_v32  ;;  %v512_v47 = vadd.f32 %v511_v42, %v510_v39  ;;  %v513_v50 = vsel %vm452_vm2, %v495_v43, 0.0 }
  0xb6   :  { %v466_v44 = vsel %vm452_vm2, %v1180_v38, 0.0  ;;  %v496_v51 = vmul.f32 %v1180_v38, %v1180_v38 }
  0xb7   :  { %v467_v48 = vadd.f32 %v466_v44, %v465_v40  ;;  %v514_v56 = vadd.f32 %v513_v50, %v512_v47  ;;  %v668_v25 = vpop.eup %667 }
  0xb8   :  { %v515_v57 = vsel %vm452_vm2, %v496_v51, 0.0  ;;  %v482_v26 = vmul.f32 1568.0, %v668_v25  ;;  %vm486_vm4 = vweird.f32 %v668_v25  ;;  %v573_v46 = vpop.permute.xlu1 %572 }
  0xb9   :  { %v516_v63 = vadd.f32 %v515_v57, %v514_v56 }
  0xba   :  { %v483_v27 = vsub.f32 1.0, %v482_v26 }
  0xbc   :  { %v484_v28 = vmul.f32 %v668_v25, %v483_v27 }
  0xbe   :  { %v1182_v41 = vpop.f32.mrf.mxu0  ;;  %v485_v29 = vadd.f32 %v668_v25, %v484_v28 }
  0xbf   :  { %v468_v45 = vsel %vm452_vm2, %v1182_v41, 0.0  ;;  %v497_v54 = vmul.f32 %v1182_v41, %v1182_v41 }
  0xc0   :  { %v1194_v49 = vpop.f32.mrf.mxu1  ;;  %v469_v52 = vadd.f32 %v468_v45, %v467_v48  ;;  %v487_v32 = vsel %vm486_vm4, %v668_v25, %v485_v29 }
  0xc1   :  { %v470_v55 = vsel %vm452_vm2, %v1194_v49, 0.0  ;;  %v517_v61 = vsel %vm452_vm2, %v497_v54, 0.0  ;;  %v498_v62 = vmul.f32 %v1194_v49, %v1194_v49 }
  0xc2   :  { %v471_v59 = vadd.f32 %v470_v55, %v469_v52  ;;  %v518_v5 = vadd.f32 %v517_v61, %v516_v63 }
  0xc3   :  { %v519_v7 = vsel %vm452_vm2, %v498_v62, 0.0 }
  0xc4   :  { %v1199_v53 = vpop.f32.mrf.mxu2  ;;  %v520_v14 = vadd.f32 %v519_v7, %v518_v5 }
  0xc5   :  { %v472_v58 = vsel %vm452_vm2, %v1199_v53, 0.0  ;;  %v499_v1 = vmul.f32 %v1199_v53, %v1199_v53 }
  0xc6   :  { %v473_v0 = vadd.f32 %v472_v58, %v471_v59 }
  0xc7   :  { %v1208_v60 = vpop.f32.mrf.mxu3  ;;  %v521_v6 = vsel %vm452_vm2, %v499_v1, 0.0 }
  0xc8   :  { %v474_v2 = vsel %vm452_vm2, %v1208_v60, 0.0  ;;  %v500_v11 = vmul.f32 %v1208_v60, %v1208_v60  ;;  %v522_v17 = vadd.f32 %v521_v6, %v520_v14 }
  0xc9   :  { %v475_v10 = vadd.f32 %v474_v2, %v473_v0 }
  0xca   :  { %v523_v19 = vsel %vm452_vm2, %v500_v11, 0.0 }
  0xcb   :  { %v524_v21 = vadd.f32 %v523_v19, %v522_v17 }
  0xd2   :  { %v1218_v9 = vpop.f32.mrf.mxu0 }
  0xd3   :  { %v477_v13 = vsel %vm476_vm3, %v1218_v9, 0.0  ;;  %v501_v16 = vmul.f32 %v1218_v9, %v1218_v9 }
  0xd4   :  { %v478_v15 = vadd.f32 %v477_v13, %v475_v10  ;;  %v592_v13 = vpop.permute.xlu1 %591 }
  0xd5   :  { %v525_v20 = vsel %vm476_vm3, %v501_v16, 0.0 }
  0xd6   :  { %479 = vadd.xlane.f32.xlu0 %v478_v15  ;;  %v526_v22 = vadd.f32 %v525_v20, %v524_v21 }
  0xde   :  { %527 = vadd.xlane.f32.xlu0 %v526_v22 }
 0x149   :  { %v480_v31 = vpop.xlane.xlu0 %479 }
 0x14a   :  { %v488_v33 = vmul.f32 %v487_v32, %v480_v31 }
 0x14c   :  { %v530_v35 = vmul.f32 %v488_v33, %v488_v33  ;;  %v532_v48 = vsub.f32 %v1134_v4, %v488_v33  ;;  %v533_v50 = vsub.f32 %v1132_v3, %v488_v33  ;;  %v534_v51 = vsub.f32 %v1140_v8, %v488_v33 }
 0x14d   :  { %v535_v52 = vsub.f32 %v1148_v12, %v488_v33  ;;  %v536_v54 = vsub.f32 %v1156_v18, %v488_v33  ;;  %v537_v55 = vsub.f32 %v1163_v24, %v488_v33  ;;  %v538_v57 = vsub.f32 %v1170_v30, %v488_v33 }
 0x14e   :  { %v539_v58 = vsub.f32 %v1180_v38, %v488_v33  ;;  %v540_v59 = vsub.f32 %v1182_v41, %v488_v33  ;;  %v541_v63 = vsub.f32 %v1194_v49, %v488_v33  ;;  %v542_v18 = vsub.f32 %v1199_v53, %v488_v33 }
 0x14f   :  { %v543_v24 = vsub.f32 %v1208_v60, %v488_v33  ;;  %v544_v1 = vsub.f32 %v1218_v9, %v488_v33 }
 0x151   :  { %v528_v34 = vpop.xlane.xlu0 %527 }
 0x152   :  { %v529_v36 = vmul.f32 %v528_v34, %v487_v32 }
 0x154   :  { %v531_v37 = vsub.f32 %v529_v36, %v530_v35 }
 0x156   :  { %v545_v39 = vadd.f32 1e-05, %v531_v37 }
 0x158   :  { %669 = vrsqrt.f32 %v545_v39  ;;  %vm552_vm6 = vweird.f32 %v545_v39 }
 0x15e   :  { %v670_v40 = vpop.eup %669 }
 0x15f   :  { %v547_v42 = vmul.f32 %v670_v40, %v545_v39  ;;  %vm553_vm5 = vweird.f32 %v670_v40 }
 0x160   :  { %vm554_vm7 = vmor %vm552_vm6, %vm553_vm5 }
 0x161   :  { %v548_v43 = vmul.f32 %v670_v40, %v547_v42 }
 0x163   :  { %v549_v44 = vmul.f32 0.5, %v548_v43 }
 0x165   :  { %v550_v45 = vsub.f32 1.5, %v549_v44 }
 0x167   :  { %v551_v47 = vmul.f32 %v670_v40, %v550_v45 }
 0x169   :  { %v555_v56 = vsel %vm554_vm7, %v670_v40, %v551_v47 }
 0x16a   :  { %v556_v61 = vmul.f32 %v555_v56, %v532_v48  ;;  %v557_v4 = vmul.f32 %v555_v56, %v533_v50  ;;  %v558_v62 = vmul.f32 %v555_v56, %v534_v51  ;;  %v559_v3 = vmul.f32 %v555_v56, %v535_v52 }
 0x16b   :  { %v560_v8 = vmul.f32 %v555_v56, %v536_v54  ;;  %v561_v0 = vmul.f32 %v555_v56, %v537_v55  ;;  %v562_v12 = vmul.f32 %v555_v56, %v538_v57  ;;  %v563_v30 = vmul.f32 %v555_v56, %v539_v58 }
 0x16c   :  { %v564_v2 = vmul.f32 %v555_v56, %v540_v59  ;;  %v575_v38 = vmul.f32 %v573_v46, %v556_v61  ;;  %v576_v5 = vmul.f32 %v573_v46, %v557_v4  ;;  %v577_v41 = vmul.f32 %v573_v46, %v558_v62 }
 0x16d   :  { %v565_v7 = vmul.f32 %v555_v56, %v541_v63  ;;  %v578_v10 = vmul.f32 %v573_v46, %v559_v3  ;;  %v579_v6 = vmul.f32 %v573_v46, %v560_v8  ;;  %v580_v11 = vmul.f32 %v573_v46, %v561_v0 }
 0x16e   :  { %v566_v49 = vmul.f32 %v555_v56, %v542_v18  ;;  %v567_v14 = vmul.f32 %v555_v56, %v543_v24  ;;  %v581_v15 = vmul.f32 %v573_v46, %v562_v12  ;;  %v568_v16 = vmul.f32 %v555_v56, %v544_v1 }
 0x16f   :  { %v582_v17 = vmul.f32 %v573_v46, %v563_v30  ;;  %v594_v53 = vadd.f32 %v592_v13, %v575_v38  ;;  %v595_v19 = vadd.f32 %v592_v13, %v576_v5  ;;  %v583_v60 = vmul.f32 %v573_v46, %v564_v2 }
 0x170   :  { %v596_v20 = vadd.f32 %v592_v13, %v577_v41  ;;  %v597_v9 = vadd.f32 %v592_v13, %v578_v10  ;;  %v598_v21 = vadd.f32 %v592_v13, %v579_v6  ;;  %v584_v22 = vmul.f32 %v573_v46, %v565_v7 }
 0x171   :  { %v599_v23 = vadd.f32 %v592_v13, %v580_v11  ;;  %v585_v25 = vmul.f32 %v573_v46, %v566_v49  ;;  %v586_v26 = vmul.f32 %v573_v46, %v567_v14  ;;  %v600_v27 = vadd.f32 %v592_v13, %v581_v15 }
 0x172   :  { %v607_v28 = vmax.f32 %v594_v53, 0.0  ;;  %v601_v29 = vadd.f32 %v592_v13, %v582_v17  ;;  %v608_v31 = vmax.f32 %v595_v19, 0.0  ;;  %v609_v32 = vmax.f32 %v596_v20, 0.0 }
 0x173   :  { %v610_v33 = vmax.f32 %v597_v9, 0.0  ;;  %v587_v34 = vmul.f32 %v573_v46, %v568_v16  ;;  %v602_v35 = vadd.f32 %v592_v13, %v583_v60  ;;  %v611_v36 = vmax.f32 %v598_v21, 0.0 }
 0x174   :  { %620 = vst [vmem:[%s1286_s4] sm:$0x3f] %v607_v28  ;;  %v603_v37 = vadd.f32 %v592_v13, %v584_v22  ;;  %v612_v39 = vmax.f32 %v599_v23, 0.0  ;;  %v604_v40 = vadd.f32 %v592_v13, %v585_v25  ;;  %v613_v42 = vmax.f32 %v600_v27, 0.0 }
 0x175   :  { %621 = vst [vmem:[%s1286_s4 + $0x8] sm:$0x3f] %v608_v31  ;;  %v605_v43 = vadd.f32 %v592_v13, %v586_v26  ;;  %v614_v44 = vmax.f32 %v601_v29, 0.0  ;;  %v606_v45 = vadd.f32 %v592_v13, %v587_v34  ;;  %v615_v46 = vmax.f32 %v602_v35, 0.0 }
 0x176   :  { %622 = vst [vmem:[%s1286_s4 + $0x10] sm:$0x3f] %v609_v32  ;;  %v616_v47 = vmax.f32 %v603_v37, 0.0  ;;  %v617_v48 = vmax.f32 %v604_v40, 0.0 }
 0x177   :  { %623 = vst [vmem:[%s1286_s4 + $0x18] sm:$0x3f] %v610_v33  ;;  %v618_v50 = vmax.f32 %v605_v43, 0.0  ;;  %v619_v51 = vmax.f32 %v606_v45, 0.0 }
 0x178   :  { %624 = vst [vmem:[%s1286_s4 + $0x20] sm:$0x3f] %v611_v36 }
 0x179   :  { %625 = vst [vmem:[%s1286_s4 + $0x28] sm:$0x3f] %v612_v39 }
 0x17a   :  { %626 = vst [vmem:[%s1286_s4 + $0x30] sm:$0x3f] %v613_v42 }
 0x17b   :  { %627 = vst [vmem:[%s1286_s4 + $0x38] sm:$0x3f] %v614_v44 }
 0x17c   :  { %628 = vst [vmem:[%s1286_s4 + $0x40] sm:$0x3f] %v615_v46 }
 0x17d   :  { %629 = vst [vmem:[%s1286_s4 + $0x48] sm:$0x3f] %v616_v47 }
 0x17e   :  { %630 = vst [vmem:[%s1286_s4 + $0x50] sm:$0x3f] %v617_v48 }
 0x17f   :  { %631 = vst [vmem:[%s1286_s4 + $0x58] sm:$0x3f] %v618_v50 }
 0x180   :  { %632 = vst.msk [vmem:[%s1286_s4 + $0x60] sm:$0x3f] %vm476_vm3, %v619_v51 }

// kernel: forward.4
= control target key start
LH: loop header
LB: loop body
LE: loop exit
PB: predicated region body
PF: predicated region fallthrough
CT: control target
= control target key end

     0   :  { %vm66_vm0 = vcmask 1045504   ;;  %vm59_vm1 = vcmask 179200   ;;  %v292_v42 = vmov 0   ;;  %vm165_vm2 = vcmask 588800   ;;  %s505_s0 = inlined_call_operand.vmem [shape: f32[150,200], index: 0, kind: input, shape index: {}]   ;;  %s506_s1 = inlined_call_operand.vmem [shape: f32[16,150], index: 1, kind: input, shape index: {}]   ;;  %s507_s2 = inlined_call_operand.vmem [shape: f32[16,1], index: 2, kind: input, shape index: {}]   ;;  %s508_s3 = inlined_call_operand.vmem [shape: f32[16,1], index: 3, kind: input, shape index: {}]   ;;  %s509_s4 = inlined_call_operand.vmem [shape: f32[16,200], index: 4, kind: output, shape index: {}]  }
   0x1   :  { %v52_v0 = vld [vmem:[%s505_s0 + $0xf8] sm:$0xff]  ;;  %v50_v1 = vld [vmem:[%s505_s0 + $0xe8] sm:$0xff]  ;;  %v51_v2 = vld [vmem:[%s505_s0 + $0xf0] sm:$0xff]  ;;  %284 = vset.pattern.permute.xlu0 %v292_v42  ;;  %285 = vset.pattern.permute.xlu1 %v292_v42 }
   0x2   :  { %119 = vmatpush.msra.mxu2 %v52_v0  ;;  %v48_v3 = vld [vmem:[%s505_s0 + $0xd8] sm:$0xff]  ;;  %73 = vmatpush.msra.mxu0 %v51_v2  ;;  %v49_v4 = vld [vmem:[%s505_s0 + $0xe0] sm:$0xff]  ;;  %v47_v5 = vld [vmem:[%s505_s0 + $0xd0] sm:$0xff] }
   0x3   :  { %v46_v6 = vld [vmem:[%s505_s0 + $0xc8] sm:$0xff]  ;;  %v45_v7 = vld [vmem:[%s505_s0 + $0xc0] sm:$0xff]  ;;  %v44_v8 = vld [vmem:[%s505_s0 + $0xb8] sm:$0xff]  ;;  %283 = vset.pattern.permute.xlu2 %v292_v42 }
   0x4   :  { %120 = vmatpush.msra.mxu2 %v50_v1  ;;  %74 = vmatpush.msra.mxu0 %v49_v4  ;;  %v43_v9 = vld [vmem:[%s505_s0 + $0xb0] sm:$0xff]  ;;  %v42_v10 = vld [vmem:[%s505_s0 + $0xa8] sm:$0xff]  ;;  %v41_v12 = vld [vmem:[%s505_s0 + $0xa0] sm:$0xff] }
   0x5   :  { %v58_v11 = vld [vmem:[%s505_s0 + $0x128] sm:$0x3f]  ;;  %v56_v13 = vld [vmem:[%s505_s0 + $0x118] sm:$0xff]  ;;  %v39_v16 = vld [vmem:[%s505_s0 + $0x90] sm:$0xff] }
   0x6   :  { %121 = vmatpush.msra.mxu2 %v48_v3  ;;  %75 = vmatpush.msra.mxu0 %v47_v5  ;;  %v40_v14 = vld [vmem:[%s505_s0 + $0x98] sm:$0xff]  ;;  %v54_v15 = vld [vmem:[%s505_s0 + $0x108] sm:$0xff]  ;;  %v57_v18 = vld [vmem:[%s505_s0 + $0x120] sm:$0x3f] }
   0x7   :  { %278 = vmatpush.msk.msra.mxu3 %vm66_vm0, %v58_v11  ;;  %v18_v17 = vld [vmem:[%s506_s1 + $0x8] sm:$0xff]  ;;  %275 = vmatpush.msk.msra.mxu1 %vm66_vm0, %v57_v18  ;;  %v55_v20 = vld [vmem:[%s505_s0 + $0x110] sm:$0xff]  ;;  %v37_v21 = vld [vmem:[%s505_s0 + $0x80] sm:$0xff] }
   0x8   :  { %122 = vmatpush.msra.mxu2 %v46_v6  ;;  %76 = vmatpush.msra.mxu0 %v45_v7  ;;  %v38_v19 = vld [vmem:[%s505_s0 + $0x88] sm:$0xff]  ;;  %v36_v22 = vld [vmem:[%s505_s0 + $0x78] sm:$0xff]  ;;  %v53_v23 = vld [vmem:[%s505_s0 + $0x100] sm:$0xff]  ;;  %v293_v7 = vmov 200.0  }
   0x9   :  { %156 = vmatpush.msra.mxu3 %v56_v13  ;;  %v35_v24 = vld [vmem:[%s505_s0 + $0x70] sm:$0xff]  ;;  %110 = vmatpush.msra.mxu1 %v55_v20  ;;  %v34_v25 = vld [vmem:[%s505_s0 + $0x68] sm:$0xff]  ;;  %v33_v26 = vld [vmem:[%s505_s0 + $0x60] sm:$0xff]  ;;  %286 = vrcp.f32 %v293_v7 }
   0xa   :  { %123 = vmatpush.msra.mxu2 %v44_v8  ;;  %77 = vmatpush.msra.mxu0 %v43_v9  ;;  %v32_v27 = vld [vmem:[%s505_s0 + $0x58] sm:$0xff]  ;;  %v31_v28 = vld [vmem:[%s505_s0 + $0x50] sm:$0xff]  ;;  %v30_v30 = vld [vmem:[%s505_s0 + $0x48] sm:$0xff] }
   0xb   :  { %157 = vmatpush.msra.mxu3 %v54_v15  ;;  %111 = vmatpush.msra.mxu1 %v53_v23  ;;  %v20_v29 = vld [vmem:[%s506_s1 + $0x18] sm:$0xff]  ;;  %v29_v31 = vld [vmem:[%s505_s0 + $0x40] sm:$0xff]  ;;  %v27_v33 = vld [vmem:[%s505_s0 + $0x30] sm:$0xff] }
   0xc   :  { %124 = vmatpush.msra.mxu2 %v42_v10  ;;  %78 = vmatpush.msra.mxu0 %v41_v12  ;;  %v28_v32 = vld [vmem:[%s505_s0 + $0x38] sm:$0xff]  ;;  %v26_v34 = vld [vmem:[%s505_s0 + $0x28] sm:$0xff]  ;;  %v25_v35 = vld [vmem:[%s505_s0 + $0x20] sm:$0xff] }
   0xd   :  { %279 = vmatmul.msk.f32.vlgmr.msra.gmra.mxu3 %vm59_vm1, %v18_v17  ;;  %276 = vmatmul.msk.f32.vlgmr.msra.gmra.mxu1 %vm59_vm1, %v18_v17  ;;  %v24_v36 = vld [vmem:[%s505_s0 + $0x18] sm:$0xff]  ;;  %v23_v37 = vld [vmem:[%s505_s0 + $0x10] sm:$0xff]  ;;  %v22_v38 = vld [vmem:[%s505_s0 + $0x8] sm:$0xff] }
   0xe   :  { %125 = vmatpush.msra.mxu2 %v40_v14  ;;  %79 = vmatpush.msra.mxu0 %v39_v16  ;;  %v17_v39 = vld [vmem:[%s506_s1] sm:$0xff]  ;;  %v19_v41 = vld [vmem:[%s506_s1 + $0x10] sm:$0xff]  ;;  %v232_v4 = vld [vmem:[%s507_s2 + $0x8] sm:$0xff] }
   0xf   :  { %v21_v40 = vld [vmem:[%s505_s0] sm:$0xff]  ;;  %v248_v6 = vld [vmem:[%s508_s3 + $0x8] sm:$0xff]  ;;  %v287_v8 = vpop.eup %286 }
  0x10   :  { %126 = vmatpush.msra.mxu2 %v38_v19  ;;  %80 = vmatpush.msra.mxu0 %v37_v21  ;;  %v231_v61 = vld [vmem:[%s507_s2] sm:$0xff]  ;;  %v175_v9 = vmul.f32 200.0, %v287_v8  ;;  %vm179_vm3 = vweird.f32 %v287_v8 }
  0x11   :  { %235 = vperm.xlu2 %283, %v231_v61   ;;  %v247_v5 = vld [vmem:[%s508_s3] sm:$0xff] }
  0x12   :  { %127 = vmatpush.msra.mxu2 %v36_v22  ;;  %81 = vmatpush.msra.mxu0 %v35_v24  ;;  %v176_v10 = vsub.f32 1.0, %v175_v9 }
  0x14   :  { %128 = vmatpush.msra.mxu2 %v34_v25  ;;  %82 = vmatpush.msra.mxu0 %v33_v26  ;;  %v177_v11 = vmul.f32 %v287_v8, %v176_v10 }
  0x15   :  { %280 = vmatmul.msk.f32.gmra.mxu3 %vm59_vm1, %v20_v29  ;;  %277 = vmatmul.msk.f32.gmra.mxu1 %vm59_vm1, %v20_v29 }
  0x16   :  { %129 = vmatpush.msra.mxu2 %v32_v27  ;;  %83 = vmatpush.msra.mxu0 %v31_v28  ;;  %v178_v12 = vadd.f32 %v287_v8, %v177_v11 }
  0x18   :  { %130 = vmatpush.msra.mxu2 %v30_v30  ;;  %84 = vmatpush.msra.mxu0 %v29_v31  ;;  %v180_v13 = vsel %vm179_vm3, %v287_v8, %v178_v12 }
  0x19   :  { %240 = vperm.xlu2 %283, %v232_v4  }
  0x1a   :  { %131 = vmatpush.msra.mxu2 %v28_v32  ;;  %85 = vmatpush.msra.mxu0 %v27_v33 }
  0x1c   :  { %132 = vmatpush.msra.mxu2 %v26_v34  ;;  %86 = vmatpush.msra.mxu0 %v25_v35 }
  0x1e   :  { %133 = vmatpush.msra.mxu2 %v24_v36  ;;  %87 = vmatpush.msra.mxu0 %v23_v37 }
  0x20   :  { %134 = vmatpush.msra.mxu2 %v22_v38  ;;  %88 = vmatpush.msra.mxu0 %v21_v40 }
  0x21   :  { %135 = vmatmul.f32.vlgmr.msra.gmra.mxu2 %v17_v39  ;;  %89 = vmatmul.f32.vlgmr.msra.gmra.mxu0 %v17_v39 }
  0x29   :  { %138 = vmatmul.f32.gmra.mxu2 %v19_v41  ;;  %92 = vmatmul.f32.gmra.mxu0 %v19_v41 }
  0x6b   :  { %v236_v39 = vpop.permute.xlu2 %235 }
  0x8a   :  { %v113_v43 = vpop.f32.mrf.mxu1 }
  0x90   :  { %v159_v45 = vpop.f32.mrf.mxu3 }
  0x92   :  { %v116_v53 = vpop.f32.mrf.mxu1 }
  0x98   :  { %v162_v56 = vpop.f32.mrf.mxu3 }
  0x9e   :  { %v90_v44 = vpop.f32.mrf.mxu0 }
  0x9f   :  { %v451_v46 = vadd.f32 %v113_v43, %v90_v44 }
  0xa1   :  { %v183_v49 = vmul.f32 %v451_v46, %v451_v46 }
  0xa4   :  { %v136_v47 = vpop.f32.mrf.mxu2 }
  0xa5   :  { %v453_v48 = vadd.f32 %v159_v45, %v136_v47 }
  0xa6   :  { %v93_v52 = vpop.f32.mrf.mxu0 }
  0xa7   :  { %v166_v50 = vsel %vm165_vm2, %v453_v48, 0.0  ;;  %v184_v51 = vmul.f32 %v453_v48, %v453_v48  ;;  %v463_v58 = vadd.f32 %v116_v53, %v93_v52 }
  0xa8   :  { %v167_v54 = vadd.f32 %v166_v50, %v451_v46 }
  0xa9   :  { %v187_v55 = vsel %vm165_vm2, %v184_v51, 0.0  ;;  %v185_v62 = vmul.f32 %v463_v58, %v463_v58 }
  0xaa   :  { %168 = vadd.xlane.f32.xlu0 %v167_v54  ;;  %v188_v57 = vadd.f32 %v187_v55, %v183_v49 }
  0xac   :  { %v139_v59 = vpop.f32.mrf.mxu2  ;;  %189 = vadd.xlane.f32.xlu1 %v188_v57 }
  0xad   :  { %v465_v60 = vadd.f32 %v162_v56, %v139_v59  ;;  %v241_v59 = vpop.permute.xlu2 %240 }
  0xaf   :  { %v170_v63 = vsel %vm165_vm2, %v465_v60, 0.0  ;;  %v186_v0 = vmul.f32 %v465_v60, %v465_v60 }
  0xb0   :  { %v171_v1 = vadd.f32 %v170_v63, %v463_v58 }
  0xb1   :  { %v191_v2 = vsel %vm165_vm2, %v186_v0, 0.0 }
  0xb2   :  { %172 = vadd.xlane.f32.xlu0 %v171_v1  ;;  %v192_v3 = vadd.f32 %v191_v2, %v185_v62 }
  0xb4   :  { %193 = vadd.xlane.f32.xlu1 %v192_v3 }
  0xc6   :  { %251 = vperm.xlu0 %284, %v247_v5  }
  0xcd   :  { %256 = vperm.xlu1 %285, %v248_v6  }
 0x11d   :  { %v169_v14 = vpop.xlane.xlu0 %168 }
 0x11e   :  { %v181_v15 = vmul.f32 %v180_v13, %v169_v14 }
 0x11f   :  { %v190_v16 = vpop.xlane.xlu1 %189 }
 0x120   :  { %v195_v17 = vmul.f32 %v190_v16, %v180_v13  ;;  %v197_v18 = vmul.f32 %v181_v15, %v181_v15  ;;  %v201_v36 = vsub.f32 %v451_v46, %v181_v15  ;;  %v202_v37 = vsub.f32 %v453_v48, %v181_v15 }
 0x122   :  { %v199_v19 = vsub.f32 %v195_v17, %v197_v18 }
 0x124   :  { %v205_v20 = vadd.f32 1e-05, %v199_v19 }
 0x125   :  { %v173_v21 = vpop.xlane.xlu0 %172 }
 0x126   :  { %288 = vrsqrt.f32 %v205_v20  ;;  %v182_v22 = vmul.f32 %v180_v13, %v173_v21  ;;  %vm213_vm5 = vweird.f32 %v205_v20 }
 0x127   :  { %v194_v23 = vpop.xlane.xlu1 %193 }
 0x128   :  { %v196_v24 = vmul.f32 %v194_v23, %v180_v13  ;;  %v198_v25 = vmul.f32 %v182_v22, %v182_v22  ;;  %v203_v46 = vsub.f32 %v463_v58, %v182_v22  ;;  %v204_v48 = vsub.f32 %v465_v60, %v182_v22 }
 0x12a   :  { %v200_v26 = vsub.f32 %v196_v24, %v198_v25 }
 0x12c   :  { %v289_v27 = vpop.eup %288  ;;  %v206_v28 = vadd.f32 1e-05, %v200_v26 }
 0x12d   :  { %v208_v29 = vmul.f32 %v289_v27, %v205_v20  ;;  %vm214_vm4 = vweird.f32 %v289_v27 }
 0x12e   :  { %290 = vrsqrt.f32 %v206_v28  ;;  %vm215_vm6 = vmor %vm213_vm5, %vm214_vm4  ;;  %vm223_vm8 = vweird.f32 %v206_v28 }
 0x12f   :  { %v209_v30 = vmul.f32 %v289_v27, %v208_v29 }
 0x131   :  { %v210_v31 = vmul.f32 0.5, %v209_v30 }
 0x133   :  { %v211_v32 = vsub.f32 1.5, %v210_v31 }
 0x134   :  { %v291_v33 = vpop.eup %290 }
 0x135   :  { %v218_v34 = vmul.f32 %v291_v33, %v206_v28  ;;  %v212_v35 = vmul.f32 %v289_v27, %v211_v32  ;;  %vm224_vm7 = vweird.f32 %v291_v33 }
 0x136   :  { %vm225_vm9 = vmor %vm223_vm8, %vm224_vm7 }
 0x137   :  { %v219_v38 = vmul.f32 %v291_v33, %v218_v34  ;;  %v216_v40 = vsel %vm215_vm6, %v289_v27, %v212_v35 }
 0x138   :  { %v227_v41 = vmul.f32 %v216_v40, %v201_v36  ;;  %v228_v42 = vmul.f32 %v216_v40, %v202_v37  ;;  %v252_v44 = vpop.permute.xlu0 %251 }
 0x139   :  { %v220_v43 = vmul.f32 0.5, %v219_v38 }
 0x13a   :  { %v243_v45 = vmul.f32 %v236_v39, %v227_v41  ;;  %v244_v47 = vmul.f32 %v236_v39, %v228_v42 }
 0x13b   :  { %v221_v49 = vsub.f32 1.5, %v220_v43 }
 0x13c   :  { %v259_v50 = vadd.f32 %v252_v44, %v243_v45  ;;  %v260_v51 = vadd.f32 %v252_v44, %v244_v47 }
 0x13d   :  { %v222_v52 = vmul.f32 %v291_v33, %v221_v49 }
 0x13e   :  { %v263_v53 = vmax.f32 %v259_v50, 0.0  ;;  %v264_v54 = vmax.f32 %v260_v51, 0.0 }
 0x13f   :  { %v226_v55 = vsel %vm225_vm9, %v291_v33, %v222_v52  ;;  %v257_v61 = vpop.permute.xlu1 %256 }
 0x140   :  { %v229_v56 = vmul.f32 %v226_v55, %v203_v46  ;;  %v230_v57 = vmul.f32 %v226_v55, %v204_v48  ;;  %267 = vst [vmem:[%s509_s4] sm:$0xff] %v263_v53 }
 0x141   :  { %268 = vst.msk [vmem:[%s509_s4 + $0x8] sm:$0xff] %vm165_vm2, %v264_v54 }
 0x142   :  { %v245_v58 = vmul.f32 %v241_v59, %v229_v56  ;;  %v246_v62 = vmul.f32 %v241_v59, %v230_v57 }
 0x144   :  { %v261_v60 = vadd.f32 %v257_v61, %v245_v58  ;;  %v262_v63 = vadd.f32 %v257_v61, %v246_v62 }
 0x146   :  { %v265_v0 = vmax.f32 %v261_v60, 0.0  ;;  %v266_v1 = vmax.f32 %v262_v63, 0.0 }
 0x148   :  { %269 = vst [vmem:[%s509_s4 + $0x10] sm:$0xff] %v265_v0 }
 0x149   :  { %270 = vst.msk [vmem:[%s509_s4 + $0x18] sm:$0xff] %vm165_vm2, %v266_v1 }

// kernel: forward.5
= control target key start
LH: loop header
LB: loop body
LE: loop exit
PB: predicated region body
PF: predicated region fallthrough
CT: control target
= control target key end

     0   :  { %vm92_vm0 = vcmask 130048   ;;  %v475_v55 = vmov 2.0   ;;  %vm175_vm1 = vcmask 975872   ;;  %vm256_vm6 = vcmask 982016   ;;  %s887_s1 = inlined_call_operand.vmem [shape: f32[400,120], index: 1, kind: input, shape index: {}]   ;;  %s888_s0 = inlined_call_operand.vmem [shape: f32[2,400], index: 0, kind: input, shape index: {}]   ;;  %s889_s2 = inlined_call_operand.vmem [shape: f32[1,120], index: 2, kind: input, shape index: {}]   ;;  %s890_s3 = inlined_call_operand.vmem [shape: f32[1,120], index: 3, kind: input, shape index: {}]   ;;  %s891_s4 = inlined_call_operand.vmem [shape: f32[120,168], index: 4, kind: input, shape index: {}]   ;;  %s892_s8 = inlined_call_operand.vmem [shape: f32[1,9], index: 8, kind: input, shape index: {}]   ;;  %s893_s7 = inlined_call_operand.vmem [shape: f32[168,9], index: 7, kind: input, shape index: {}]   ;;  %s894_s5 = inlined_call_operand.vmem [shape: f32[1,168], index: 5, kind: input, shape index: {}]   ;;  %s895_s6 = inlined_call_operand.vmem [shape: f32[1,168], index: 6, kind: input, shape index: {}]   ;;  %s896_s9 = inlined_call_operand.vmem [shape: f32[2,9], index: 9, kind: output, shape index: {}]  }
   0x1   :  { %v80_v0 = vld [vmem:[%s887_s1 + $0x178] sm:$0xff]  ;;  %v79_v1 = vld [vmem:[%s887_s1 + $0x170] sm:$0xff]  ;;  %v78_v5 = vld [vmem:[%s887_s1 + $0x168] sm:$0xff]  ;;  %467 = vrcp.f32 %v475_v55  ;;  %vm308_vm7 = vcmask 320512   ;;  %vm300_vm8 = vcmask 1041408   ;;  %vm409_vm15 = vcmask 326656  }
   0x2   :  { %v48_v2 = vld [vmem:[%s887_s1 + $0x78] sm:$0xff]  ;;  %135 = vmatpush.msra.mxu2 %v80_v0  ;;  %v47_v4 = vld [vmem:[%s887_s1 + $0x70] sm:$0xff]  ;;  %v46_v7 = vld [vmem:[%s887_s1 + $0x68] sm:$0xff] }
   0x3   :  { %95 = vmatpush.msra.mxu0 %v48_v2  ;;  %v64_v3 = vld [vmem:[%s887_s1 + $0xf8] sm:$0xff]  ;;  %v63_v6 = vld [vmem:[%s887_s1 + $0xf0] sm:$0xff]  ;;  %v62_v8 = vld [vmem:[%s887_s1 + $0xe8] sm:$0xff] }
   0x4   :  { %115 = vmatpush.msra.mxu1 %v64_v3  ;;  %136 = vmatpush.msra.mxu2 %v79_v1  ;;  %v77_v9 = vld [vmem:[%s887_s1 + $0x160] sm:$0xff]  ;;  %v76_v12 = vld [vmem:[%s887_s1 + $0x158] sm:$0xff]  ;;  %v75_v15 = vld [vmem:[%s887_s1 + $0x150] sm:$0xff] }
   0x5   :  { %96 = vmatpush.msra.mxu0 %v47_v4  ;;  %v45_v10 = vld [vmem:[%s887_s1 + $0x60] sm:$0xff]  ;;  %v44_v13 = vld [vmem:[%s887_s1 + $0x58] sm:$0xff]  ;;  %v43_v16 = vld [vmem:[%s887_s1 + $0x50] sm:$0xff] }
   0x6   :  { %116 = vmatpush.msra.mxu1 %v63_v6  ;;  %137 = vmatpush.msra.mxu2 %v78_v5  ;;  %v61_v11 = vld [vmem:[%s887_s1 + $0xe0] sm:$0xff]  ;;  %v60_v14 = vld [vmem:[%s887_s1 + $0xd8] sm:$0xff]  ;;  %v59_v17 = vld [vmem:[%s887_s1 + $0xd0] sm:$0xff] }
   0x7   :  { %97 = vmatpush.msra.mxu0 %v46_v7  ;;  %v74_v18 = vld [vmem:[%s887_s1 + $0x148] sm:$0xff]  ;;  %v73_v21 = vld [vmem:[%s887_s1 + $0x140] sm:$0xff]  ;;  %v72_v24 = vld [vmem:[%s887_s1 + $0x138] sm:$0xff]  ;;  %v697_v0 = vpop.eup %467 }
   0x8   :  { %117 = vmatpush.msra.mxu1 %v62_v8  ;;  %138 = vmatpush.msra.mxu2 %v77_v9  ;;  %v42_v19 = vld [vmem:[%s887_s1 + $0x48] sm:$0xff]  ;;  %v41_v22 = vld [vmem:[%s887_s1 + $0x40] sm:$0xff]  ;;  %v40_v25 = vld [vmem:[%s887_s1 + $0x38] sm:$0xff]  ;;  %v184_v6 = vmul.f32 2.0, %v697_v0  ;;  %vm188_vm2 = vweird.f32 %v697_v0 }
   0x9   :  { %98 = vmatpush.msra.mxu0 %v45_v10  ;;  %v58_v20 = vld [vmem:[%s887_s1 + $0xc8] sm:$0xff]  ;;  %v57_v23 = vld [vmem:[%s887_s1 + $0xc0] sm:$0xff]  ;;  %v56_v27 = vld [vmem:[%s887_s1 + $0xb8] sm:$0xff] }
   0xa   :  { %118 = vmatpush.msra.mxu1 %v61_v11  ;;  %139 = vmatpush.msra.mxu2 %v76_v12  ;;  %v82_v26 = vld [vmem:[%s887_s1 + $0x188] sm:$0xff]  ;;  %v32_v28 = vld [vmem:[%s888_s0] sm:$0xff]  ;;  %v71_v29 = vld [vmem:[%s887_s1 + $0x130] sm:$0xff] }
   0xb   :  { %99 = vmatpush.msra.mxu0 %v44_v13  ;;  %v39_v30 = vld [vmem:[%s887_s1 + $0x30] sm:$0xff]  ;;  %169 = vmatpush.msra.mxu3 %v82_v26  ;;  %84 = vst [vmem:[#allocation1] ss:$4 sm:$0xff] %v32_v28  ;;  %v81_v31 = vld [vmem:[%s887_s1 + $0x180] sm:$0xff]  ;;  %v70_v33 = vld [vmem:[%s887_s1 + $0x128] sm:$0xff] }
   0xc   :  { %119 = vmatpush.msra.mxu1 %v60_v14  ;;  %140 = vmatpush.msra.mxu2 %v75_v15  ;;  %v55_v32 = vld [vmem:[%s887_s1 + $0xb0] sm:$0xff]  ;;  %v38_v34 = vld [vmem:[%s887_s1 + $0x28] sm:$0xff]  ;;  %v69_v36 = vld [vmem:[%s887_s1 + $0x120] sm:$0xff]  ;;  %v185_v15 = vsub.f32 1.0, %v184_v6 }
   0xd   :  { %100 = vmatpush.msra.mxu0 %v43_v16  ;;  %170 = vmatpush.msra.mxu3 %v81_v31  ;;  %v54_v35 = vld [vmem:[%s887_s1 + $0xa8] sm:$0xff]  ;;  %v37_v37 = vld [vmem:[%s887_s1 + $0x20] sm:$0xff]  ;;  %v68_v39 = vld [vmem:[%s887_s1 + $0x118] sm:$0xff] }
   0xe   :  { %120 = vmatpush.msra.mxu1 %v59_v17  ;;  %141 = vmatpush.msra.mxu2 %v74_v18  ;;  %v53_v38 = vld [vmem:[%s887_s1 + $0xa0] sm:$0xff]  ;;  %v36_v40 = vld [vmem:[%s887_s1 + $0x18] sm:$0xff]  ;;  %v67_v43 = vld [vmem:[%s887_s1 + $0x110] sm:$0xff] }
   0xf   :  { %101 = vmatpush.msra.mxu0 %v42_v19  ;;  %v52_v41 = vld [vmem:[%s887_s1 + $0x98] sm:$0xff]  ;;  %v35_v44 = vld [vmem:[%s887_s1 + $0x10] sm:$0xff]  ;;  %v66_v46 = vld [vmem:[%s887_s1 + $0x108] sm:$0xff] }
  0x10   :  { %121 = vmatpush.msra.mxu1 %v58_v20  ;;  %142 = vmatpush.msra.mxu2 %v73_v21  ;;  %v51_v45 = vld [vmem:[%s887_s1 + $0x90] sm:$0xff]  ;;  %v34_v47 = vld [vmem:[%s887_s1 + $0x8] sm:$0xff]  ;;  %v65_v49 = vld [vmem:[%s887_s1 + $0x100] sm:$0xff] }
  0x11   :  { %102 = vmatpush.msra.mxu0 %v41_v22  ;;  %v50_v48 = vld [vmem:[%s887_s1 + $0x88] sm:$0xff]  ;;  %v33_v50 = vld [vmem:[%s887_s1] sm:$0xff]  ;;  %v252_v58 = vld [vmem:[%s891_s4 + $0xd0] sm:$0xff] }
  0x12   :  { %122 = vmatpush.msra.mxu1 %v57_v23  ;;  %143 = vmatpush.msra.mxu2 %v72_v24  ;;  %v88_v42 = vld.sshfl [vmem:[#allocation1 + $0x18] sm:$0xff pattern:$0x73625140]  ;;  %v87_v51 = vld.sshfl [vmem:[#allocation1 + $0x10] sm:$0xff pattern:$0x73625140]  ;;  %v186_v23 = vmul.f32 %v697_v0, %v185_v15 }
  0x13   :  { %103 = vmatpush.msra.mxu0 %v40_v25  ;;  %459 = vmatmul.msk.f32.vlgmr.msra.gmra.mxu3 %vm92_vm0, %v88_v42  ;;  %v49_v52 = vld [vmem:[%s887_s1 + $0x80] sm:$0xff]  ;;  %v86_v54 = vld.sshfl [vmem:[#allocation1 + $0x8] sm:$0xff pattern:$0x73625140]  ;;  %v253_v59 = vld [vmem:[%s891_s4 + $0xd8] sm:$0xff]  ;;  %vm453_vm0 = vcmask 66560  }
  0x14   :  { %123 = vmatpush.msra.mxu1 %v56_v27  ;;  %144 = vmatpush.msra.mxu2 %v71_v29  ;;  %v85_v53 = vld.sshfl [vmem:[#allocation1] sm:$0xff pattern:$0x73625140]  ;;  %v255_v57 = vld [vmem:[%s891_s4 + $0xe8] sm:$0xff]  ;;  %v248_v1 = vld [vmem:[%s891_s4 + $0xb0] sm:$0xff] }
  0x15   :  { %104 = vmatpush.msra.mxu0 %v39_v30  ;;  %v254_v56 = vld [vmem:[%s891_s4 + $0xe0] sm:$0xff]  ;;  %v251_v61 = vld [vmem:[%s891_s4 + $0xc8] sm:$0xff]  ;;  %v249_v2 = vld [vmem:[%s891_s4 + $0xb8] sm:$0xff] }
  0x16   :  { %124 = vmatpush.msra.mxu1 %v55_v32  ;;  %145 = vmatpush.msra.mxu2 %v70_v33  ;;  %v250_v60 = vld [vmem:[%s891_s4 + $0xc0] sm:$0xff]  ;;  %v247_v5 = vld [vmem:[%s891_s4 + $0xa8] sm:$0xff]  ;;  %v244_v9 = vld [vmem:[%s891_s4 + $0x90] sm:$0xff]  ;;  %v187_v33 = vadd.f32 %v697_v0, %v186_v23 }
  0x17   :  { %105 = vmatpush.msra.mxu0 %v38_v34  ;;  %261 = vmatpush.msrb.mxu3 %v254_v56  ;;  %v246_v4 = vld [vmem:[%s891_s4 + $0xa0] sm:$0xff]  ;;  %v245_v10 = vld [vmem:[%s891_s4 + $0x98] sm:$0xff]  ;;  %v243_v13 = vld [vmem:[%s891_s4 + $0x88] sm:$0xff] }
  0x18   :  { %125 = vmatpush.msra.mxu1 %v54_v35  ;;  %146 = vmatpush.msra.mxu2 %v69_v36  ;;  %v242_v12 = vld [vmem:[%s891_s4 + $0x80] sm:$0xff]  ;;  %v240_v16 = vld [vmem:[%s891_s4 + $0x70] sm:$0xff]  ;;  %v241_v17 = vld [vmem:[%s891_s4 + $0x78] sm:$0xff] }
  0x19   :  { %106 = vmatpush.msra.mxu0 %v37_v37  ;;  %262 = vmatpush.msrb.mxu3 %v252_v58  ;;  %v238_v21 = vld [vmem:[%s891_s4 + $0x60] sm:$0xff]  ;;  %v239_v22 = vld [vmem:[%s891_s4 + $0x68] sm:$0xff]  ;;  %v236_v27 = vld [vmem:[%s891_s4 + $0x50] sm:$0xff] }
  0x1a   :  { %126 = vmatpush.msra.mxu1 %v53_v38  ;;  %147 = vmatpush.msra.mxu2 %v68_v39  ;;  %v237_v28 = vld [vmem:[%s891_s4 + $0x58] sm:$0xff]  ;;  %v234_v31 = vld [vmem:[%s891_s4 + $0x40] sm:$0xff]  ;;  %v235_v32 = vld [vmem:[%s891_s4 + $0x48] sm:$0xff] }
  0x1b   :  { %107 = vmatpush.msra.mxu0 %v36_v40  ;;  %263 = vmatpush.msrb.mxu3 %v250_v60  ;;  %v232_v36 = vld [vmem:[%s891_s4 + $0x30] sm:$0xff]  ;;  %v233_v37 = vld [vmem:[%s891_s4 + $0x38] sm:$0xff]  ;;  %v230_v40 = vld [vmem:[%s891_s4 + $0x20] sm:$0xff] }
  0x1c   :  { %127 = vmatpush.msra.mxu1 %v52_v41  ;;  %148 = vmatpush.msra.mxu2 %v67_v43  ;;  %v231_v41 = vld [vmem:[%s891_s4 + $0x28] sm:$0xff]  ;;  %v228_v42 = vld [vmem:[%s891_s4 + $0x10] sm:$0xff]  ;;  %v774_v43 = vsel %vm188_vm2, %v697_v0, %v187_v33 }
  0x1d   :  { %108 = vmatpush.msra.mxu0 %v35_v44  ;;  %264 = vmatpush.msrb.mxu3 %v248_v1  ;;  %v229_v44 = vld [vmem:[%s891_s4 + $0x18] sm:$0xff]  ;;  %v465_v1 = vld [vmem:[%s890_s3] ss:$0 sm:$0xff]  ;;  %v398_v6 = vld [vmem:[%s893_s7 + $0x70] sm:$0xff] }
  0x1e   :  { %128 = vmatpush.msra.mxu1 %v51_v45  ;;  %149 = vmatpush.msra.mxu2 %v66_v46 }
  0x1f   :  { %109 = vmatpush.msra.mxu0 %v34_v47  ;;  %265 = vmatpush.msrb.mxu3 %v246_v4  ;;  %v226_v47 = vld [vmem:[%s891_s4] sm:$0xff] }
  0x20   :  { %129 = vmatpush.msra.mxu1 %v50_v48  ;;  %150 = vmatpush.msra.mxu2 %v65_v49  ;;  %v227_v48 = vld [vmem:[%s891_s4 + $0x8] sm:$0xff] }
  0x21   :  { %110 = vmatpush.msra.mxu0 %v33_v50  ;;  %151 = vmatmul.f32.vlgmr.msra.gmra.mxu2 %v87_v51 }
  0x22   :  { %130 = vmatpush.msra.mxu1 %v49_v52  ;;  %111 = vmatmul.f32.vlgmr.msra.gmra.mxu0 %v85_v53 }
  0x23   :  { %131 = vmatmul.f32.vlgmr.msra.gmra.mxu1 %v86_v54  ;;  %281 = vmatpush.msrb.mxu0 %v255_v57 }
  0x24   :  { %266 = vmatpush.msrb.mxu3 %v244_v9  ;;  %v395_v9 = vld [vmem:[%s893_s7 + $0x58] sm:$0xff] }
  0x25   :  { %282 = vmatpush.msrb.mxu0 %v253_v59 }
  0x26   :  { %267 = vmatpush.msrb.mxu3 %v242_v12 }
  0x27   :  { %283 = vmatpush.msrb.mxu0 %v251_v61 }
  0x28   :  { %268 = vmatpush.msrb.mxu3 %v240_v16  ;;  %v393_v16 = vld [vmem:[%s893_s7 + $0x48] sm:$0xff] }
  0x29   :  { %284 = vmatpush.msrb.mxu0 %v249_v2 }
  0x2a   :  { %269 = vmatpush.msrb.mxu3 %v238_v21 }
  0x2b   :  { %285 = vmatpush.msrb.mxu0 %v247_v5  ;;  %v399_v5 = vld [vmem:[%s893_s7 + $0x78] sm:$0xff] }
  0x2c   :  { %270 = vmatpush.msrb.mxu3 %v236_v27  ;;  %413 = vmatpush.msrb.mxu1 %v399_v5 }
  0x2d   :  { %286 = vmatpush.msrb.mxu0 %v245_v10 }
  0x2e   :  { %271 = vmatpush.msrb.mxu3 %v234_v31  ;;  %414 = vmatpush.msrb.mxu1 %v398_v6  ;;  %v390_v31 = vld [vmem:[%s893_s7 + $0x30] sm:$0xff] }
  0x2f   :  { %287 = vmatpush.msrb.mxu0 %v243_v13  ;;  %v394_v13 = vld [vmem:[%s893_s7 + $0x50] sm:$0xff] }
  0x30   :  { %272 = vmatpush.msrb.mxu3 %v232_v36 }
  0x31   :  { %288 = vmatpush.msrb.mxu0 %v241_v17 }
  0x32   :  { %273 = vmatpush.msrb.mxu3 %v230_v40 }
  0x33   :  { %289 = vmatpush.msrb.mxu0 %v239_v22 }
  0x34   :  { %274 = vmatpush.msrb.mxu3 %v228_v42 }
  0x35   :  { %290 = vmatpush.msrb.mxu0 %v237_v28 }
  0x36   :  { %275 = vmatpush.msrb.mxu3 %v226_v47 }
  0x37   :  { %291 = vmatpush.msrb.mxu0 %v235_v32  ;;  %v403_v32 = vld [vmem:[%s893_s7 + $0x98] sm:$0xff] }
  0x39   :  { %292 = vmatpush.msrb.mxu0 %v233_v37  ;;  %v389_v37 = vld [vmem:[%s893_s7 + $0x28] sm:$0xff] }
  0x3b   :  { %293 = vmatpush.msrb.mxu0 %v231_v41 }
  0x3d   :  { %294 = vmatpush.msrb.mxu0 %v229_v44  ;;  %v388_v44 = vld [vmem:[%s893_s7 + $0x20] sm:$0xff] }
  0x3f   :  { %295 = vmatpush.msrb.mxu0 %v227_v48 }
  0x96   :  { %v172_v8 = vpop.f32.mrf.mxu3 }
  0x9f   :  { %v112_v62 = vpop.f32.mrf.mxu0 }
  0xa0   :  { %v132_v63 = vpop.f32.mrf.mxu1 }
  0xa1   :  { %v133_v3 = vadd.f32 %v132_v63, %v112_v62  ;;  %v464_v62 = vld [vmem:[%s889_s2] ss:$0 sm:$0xff] }
  0xa4   :  { %v152_v7 = vpop.f32.mrf.mxu2 }
  0xa5   :  { %v153_v11 = vadd.f32 %v152_v7, %v133_v3  ;;  %v397_v7 = vld [vmem:[%s893_s7 + $0x68] sm:$0xff] }
  0xa6   :  { %415 = vmatpush.msrb.mxu1 %v397_v7 }
  0xa7   :  { %v724_v14 = vadd.f32 %v172_v8, %v153_v11  ;;  %v396_v8 = vld [vmem:[%s893_s7 + $0x60] sm:$0xff] }
  0xa8   :  { %416 = vmatpush.msrb.mxu1 %v396_v8 }
  0xa9   :  { %v176_v18 = vsel %vm175_vm1, %v724_v14, 0.0  ;;  %v191_v19 = vmul.f32 %v724_v14, %v724_v14 }
  0xaa   :  { %v177_v20 = vrot.slane %v176_v18, 4  ;;  %417 = vmatpush.msrb.mxu1 %v395_v9 }
  0xab   :  { %v192_v24 = vsel %vm175_vm1, %v191_v19, 0.0  ;;  %v392_v19 = vld [vmem:[%s893_s7 + $0x40] sm:$0xff] }
  0xac   :  { %v178_v25 = vadd.f32 %v177_v20, %v176_v18  ;;  %v193_v26 = vrot.slane %v192_v24, 4  ;;  %418 = vmatpush.msrb.mxu1 %v394_v13 }
  0xae   :  { %v179_v29 = vrot.slane %v178_v25, 2  ;;  %v194_v30 = vadd.f32 %v193_v26, %v192_v24  ;;  %419 = vmatpush.msrb.mxu1 %v393_v16  ;;  %v404_v26 = vld [vmem:[%s893_s7 + $0xa0] sm:$0xff] }
  0xaf   :  { %444 = vmatpush.msrb.mxu2 %v404_v26 }
  0xb0   :  { %v180_v34 = vadd.f32 %v179_v29, %v178_v25  ;;  %v195_v35 = vrot.slane %v194_v30, 2  ;;  %420 = vmatpush.msrb.mxu1 %v392_v19  ;;  %v391_v25 = vld [vmem:[%s893_s7 + $0x38] sm:$0xff] }
  0xb1   :  { %445 = vmatpush.msrb.mxu2 %v403_v32 }
  0xb2   :  { %v181_v38 = vrot.slane %v180_v34, 1  ;;  %v196_v39 = vadd.f32 %v195_v35, %v194_v30  ;;  %421 = vmatpush.msrb.mxu1 %v391_v25 }
  0xb4   :  { %v182_v45 = vadd.f32 %v181_v38, %v180_v34  ;;  %v197_v46 = vrot.slane %v196_v39, 1  ;;  %422 = vmatpush.msrb.mxu1 %v390_v31  ;;  %v402_v38 = vld [vmem:[%s893_s7 + $0x90] sm:$0xff] }
  0xb5   :  { %446 = vmatpush.msrb.mxu2 %v402_v38 }
  0xb6   :  { %v190_v49 = vmul.f32 %v774_v43, %v182_v45  ;;  %v198_v50 = vadd.f32 %v197_v46, %v196_v39  ;;  %423 = vmatpush.msrb.mxu1 %v389_v37  ;;  %v401_v45 = vld [vmem:[%s893_s7 + $0x88] sm:$0xff] }
  0xb7   :  { %447 = vmatpush.msrb.mxu2 %v401_v45 }
  0xb8   :  { %v199_v51 = vmul.f32 %v198_v50, %v774_v43  ;;  %v200_v52 = vmul.f32 %v190_v49, %v190_v49  ;;  %v202_v61 = vsub.f32 %v724_v14, %v190_v49  ;;  %424 = vmatpush.msrb.mxu1 %v388_v44  ;;  %v387_v50 = vld [vmem:[%s893_s7 + $0x18] sm:$0xff] }
  0xba   :  { %v201_v53 = vsub.f32 %v199_v51, %v200_v52  ;;  %v400_v51 = vld [vmem:[%s893_s7 + $0x80] sm:$0xff]  ;;  %425 = vmatpush.msrb.mxu1 %v387_v50 }
  0xbb   :  { %448 = vmatpush.msrb.mxu2 %v400_v51 }
  0xbc   :  { %v203_v54 = vadd.f32 1e-05, %v201_v53 }
  0xbe   :  { %469 = vrsqrt.f32 %v203_v54  ;;  %vm210_vm4 = vweird.f32 %v203_v54 }
  0xc4   :  { %v470_v55 = vpop.eup %469 }
  0xc5   :  { %v205_v56 = vmul.f32 %v470_v55, %v203_v54  ;;  %vm211_vm3 = vweird.f32 %v470_v55 }
  0xc6   :  { %vm212_vm5 = vmor %vm210_vm4, %vm211_vm3 }
  0xc7   :  { %v206_v57 = vmul.f32 %v470_v55, %v205_v56  ;;  %v386_v56 = vld [vmem:[%s893_s7 + $0x10] sm:$0xff] }
  0xc8   :  { %426 = vmatpush.msrb.mxu1 %v386_v56 }
  0xc9   :  { %v207_v58 = vmul.f32 0.5, %v206_v57  ;;  %v385_v57 = vld [vmem:[%s893_s7 + $0x8] sm:$0xff] }
  0xca   :  { %427 = vmatpush.msrb.mxu1 %v385_v57 }
  0xcb   :  { %v208_v59 = vsub.f32 1.5, %v207_v58 }
  0xcd   :  { %v209_v60 = vmul.f32 %v470_v55, %v208_v59 }
  0xcf   :  { %v213_v63 = vsel %vm212_vm5, %v470_v55, %v209_v60 }
  0xd0   :  { %v214_v0 = vmul.f32 %v213_v63, %v202_v61  ;;  %v384_v61 = vld [vmem:[%s893_s7] sm:$0xff] }
  0xd1   :  { %428 = vmatpush.msrb.mxu1 %v384_v61 }
  0xd2   :  { %v219_v2 = vmul.f32 %v464_v62, %v214_v0 }
  0xd4   :  { %v224_v3 = vadd.f32 %v465_v1, %v219_v2 }
  0xd6   :  { %v225_v4 = vmax.f32 %v224_v3, 0.0 }
  0xd8   :  { %460 = vmatmul.msk.f32.vlgmr.msrb.gmra.mxu3 %vm256_vm6, %v225_v4  ;;  %461 = vmatmul.msk.f32.vlgmr.msrb.gmra.mxu0 %vm256_vm6, %v225_v4 }
 0x155   :  { %v809_v10 = vpop.f32.mrf.mxu0 }
 0x156   :  { %v309_v11 = vsel %vm308_vm7, %v809_v10, 0.0  ;;  %v319_v12 = vmul.f32 %v809_v10, %v809_v10 }
 0x157   :  { %v310_v14 = vrot.slane %v309_v11, 4 }
 0x158   :  { %v327_v15 = vsel %vm308_vm7, %v319_v12, 0.0  ;;  %v366_v12 = vld [vmem:[%s894_s5] sm:$0x3] }
 0x159   :  { %v311_v17 = vadd.f32 %v310_v14, %v309_v11  ;;  %v328_v18 = vrot.slane %v327_v15, 4  ;;  %v369_v16 = vperm.slane %v366_v12, 1 }
 0x15b   :  { %v312_v20 = vrot.slane %v311_v17, 2  ;;  %v329_v21 = vadd.f32 %v328_v18, %v327_v15  ;;  %v823_v22 = vpop.f32.mrf.mxu3 }
 0x15c   :  { %v301_v23 = vsel %vm300_vm8, %v823_v22, 0.0  ;;  %v318_v24 = vmul.f32 %v823_v22, %v823_v22 }
 0x15d   :  { %v313_v27 = vadd.f32 %v312_v20, %v311_v17  ;;  %v330_v28 = vrot.slane %v329_v21, 2  ;;  %v302_v29 = vrot.slane %v301_v23, 4 }
 0x15e   :  { %v320_v30 = vsel %vm300_vm8, %v318_v24, 0.0 }
 0x15f   :  { %v314_v33 = vrot.slane %v313_v27, 1  ;;  %v331_v34 = vadd.f32 %v330_v28, %v329_v21  ;;  %v303_v35 = vadd.f32 %v302_v29, %v301_v23  ;;  %v321_v36 = vrot.slane %v320_v30, 4 }
 0x160   :  { %v368_v28 = vperm.slane %v366_v12, 0 }
 0x161   :  { %v315_v39 = vadd.f32 %v314_v33, %v313_v27  ;;  %v332_v40 = vrot.slane %v331_v34, 1  ;;  %v304_v41 = vrot.slane %v303_v35, 2  ;;  %v322_v42 = vadd.f32 %v321_v36, %v320_v30 }
 0x163   :  { %v317_v46 = vmul.f32 %v315_v39, %v774_v43  ;;  %v333_v47 = vadd.f32 %v332_v40, %v331_v34  ;;  %v305_v48 = vadd.f32 %v304_v41, %v303_v35  ;;  %v323_v49 = vrot.slane %v322_v42, 2  ;;  %v466_v35 = vld [vmem:[%s892_s8] ss:$0 sm:$0xff] }
 0x165   :  { %v335_v52 = vmul.f32 %v333_v47, %v774_v43  ;;  %v337_v53 = vmul.f32 %v317_v46, %v317_v46  ;;  %v306_v54 = vrot.slane %v305_v48, 1  ;;  %v324_v55 = vadd.f32 %v323_v49, %v322_v42 }
 0x166   :  { %v341_v15 = vsub.f32 %v809_v10, %v317_v46 }
 0x167   :  { %v339_v58 = vsub.f32 %v335_v52, %v337_v53  ;;  %v307_v59 = vadd.f32 %v306_v54, %v305_v48  ;;  %v325_v60 = vrot.slane %v324_v55, 1 }
 0x169   :  { %v343_v62 = vadd.f32 1e-05, %v339_v58  ;;  %v316_v63 = vmul.f32 %v307_v59, %v774_v43  ;;  %v326_v0 = vadd.f32 %v325_v60, %v324_v55 }
 0x16b   :  { %471 = vrsqrt.f32 %v343_v62  ;;  %v336_v1 = vmul.f32 %v316_v63, %v316_v63  ;;  %v334_v2 = vmul.f32 %v326_v0, %v774_v43  ;;  %vm360_vm10 = vweird.f32 %v343_v62  ;;  %v374_v43 = vld [vmem:[%s895_s6] sm:$0x3] }
 0x16c   :  { %v377_v20 = vperm.slane %v374_v43, 1  ;;  %v340_v27 = vsub.f32 %v823_v22, %v316_v63  ;;  %v376_v31 = vperm.slane %v374_v43, 0 }
 0x16d   :  { %v338_v3 = vsub.f32 %v334_v2, %v336_v1 }
 0x16f   :  { %v342_v4 = vadd.f32 1e-05, %v338_v3 }
 0x171   :  { %v472_v5 = vpop.eup %471  ;;  %473 = vrsqrt.f32 %v342_v4  ;;  %vm350_vm13 = vweird.f32 %v342_v4 }
 0x172   :  { %v355_v6 = vmul.f32 %v472_v5, %v343_v62  ;;  %vm361_vm9 = vweird.f32 %v472_v5 }
 0x173   :  { %vm362_vm11 = vmor %vm360_vm10, %vm361_vm9 }
 0x174   :  { %v356_v7 = vmul.f32 %v472_v5, %v355_v6 }
 0x176   :  { %v357_v8 = vmul.f32 0.5, %v356_v7 }
 0x177   :  { %v474_v9 = vpop.eup %473 }
 0x178   :  { %v358_v11 = vsub.f32 1.5, %v357_v8  ;;  %v345_v13 = vmul.f32 %v474_v9, %v342_v4  ;;  %vm351_vm12 = vweird.f32 %v474_v9 }
 0x179   :  { %vm352_vm14 = vmor %vm350_vm13, %vm351_vm12 }
 0x17a   :  { %v359_v14 = vmul.f32 %v472_v5, %v358_v11  ;;  %v346_v17 = vmul.f32 %v474_v9, %v345_v13 }
 0x17c   :  { %v363_v18 = vsel %vm362_vm11, %v472_v5, %v359_v14  ;;  %v347_v21 = vmul.f32 0.5, %v346_v17 }
 0x17d   :  { %v365_v19 = vmul.f32 %v363_v18, %v341_v15 }
 0x17e   :  { %v348_v24 = vsub.f32 1.5, %v347_v21 }
 0x17f   :  { %v373_v23 = vmul.f32 %v369_v16, %v365_v19 }
 0x180   :  { %v349_v26 = vmul.f32 %v474_v9, %v348_v24 }
 0x181   :  { %v381_v25 = vadd.f32 %v377_v20, %v373_v23 }
 0x182   :  { %v353_v29 = vsel %vm352_vm14, %v474_v9, %v349_v26 }
 0x183   :  { %v383_v10 = vmax.f32 %v381_v25, 0.0  ;;  %v364_v30 = vmul.f32 %v353_v29, %v340_v27 }
 0x185   :  { %462 = vmatmul.msk.f32.vlgmr.msrb.gmra.mxu2 %vm409_vm15, %v383_v10  ;;  %v372_v32 = vmul.f32 %v368_v28, %v364_v30 }
 0x187   :  { %v380_v33 = vadd.f32 %v376_v31, %v372_v32 }
 0x189   :  { %v382_v34 = vmax.f32 %v380_v33, 0.0 }
 0x18b   :  { %429 = vmatmul.f32.vlgmr.msrb.gmra.mxu1 %v382_v34 }
 0x208   :  { %v430_v36 = vpop.f32.mrf.mxu1  ;;  %v450_v38 = vpop.f32.mrf.mxu2 }
 0x209   :  { %v431_v37 = vadd.f32 %v466_v35, %v430_v36 }
 0x20b   :  { %v451_v22 = vadd.f32 %v450_v38, %v431_v37 }
 0x20d   :  { %454 = vst.msk [vmem:[%s896_s9] sm:$0x3] %vm453_vm0, %v451_v22 }

</bundles_post_ra>
